<compile_context>
chip_gen: v5e
topology: v5e:2x2
jax: 0.10.0
libtpu: 0.0.40
codegen_flags: <defaults>
</compile_context>

<pallas_src>
import functools

import jax
import jax.numpy as jnp
from jax.experimental import pallas as pl
from jax.experimental.pallas import tpu as pltpu


def _round_up(x, m):
    return (x + m - 1) // m * m


# --------------------------------------------------------------------------- #
# Kernel: one T-chunk of the GRU recurrence (+ fc epilogue on the last chunk)
# --------------------------------------------------------------------------- #
def gru_classifier_kernel(i_slab_ref, w_h_ref, b_hn_ref, w_fc_ref, b_fc_ref,
                          out_ref, h_ref, *, t_total, t_chunk, unroll):
    """
    i_slab_ref : (t_chunk, Bp, 3*Hp) bf16 -- x @ [W_ir|W_iz|W_in], biases folded
    w_h_ref    : (Hp, 3*Hp)          bf16 -- [W_hr|W_hz|W_hn] (transposed, padded)
    b_hn_ref   : (1, Hp)             f32  -- hidden bias of the n-gate
    w_fc_ref   : (Hp, Cp)            bf16
    b_fc_ref   : (1, Cp)             f32
    out_ref    : (Bp, Cp)            f32  -- lane-dense padded logits
    h_ref      : (Bp, Hp)            f32  -- VMEM scratch, carried across chunks
    """
    chunk = pl.program_id(0)
    n_chunks = pl.num_programs(0)
    Tc, B, _ = i_slab_ref.shape
    Hp = w_h_ref.shape[0]

    @pl.when(chunk == 0)
    def _():
        h_ref[...] = jnp.zeros_like(h_ref)

    w_h = w_h_ref[...]
    # Hoisted once per chunk: JAX does not CSE broadcast_in_dim, so keeping the
    # (1,Hp)->(B,Hp) broadcast inside the unrolled step re-materializes it T times.
    b_hn = jnp.broadcast_to(b_hn_ref[...], (B, Hp))

    needs_mask = (t_total % t_chunk) != 0   # static: only emit the select if T was padded
    base_t = chunk * t_chunk

    def step(t, h):
        gi = i_slab_ref[t].astype(jnp.float32)                       # (B, 3*Hp) f32
        # Single fused hidden matmul per step (bf16 MXU inputs, f32 accumulate).
        gh = jnp.dot(h.astype(jnp.bfloat16), w_h,
                     preferred_element_type=jnp.float32)             # (B, 3*Hp) f32
        r = jax.nn.sigmoid(gi[:, 0 * Hp:1 * Hp] + gh[:, 0 * Hp:1 * Hp])
        z = jax.nn.sigmoid(gi[:, 1 * Hp:2 * Hp] + gh[:, 1 * Hp:2 * Hp])
        n = jnp.tanh(gi[:, 2 * Hp:3 * Hp] + r * (gh[:, 2 * Hp:3 * Hp] + b_hn))
        # h' = (1 - z) * n + z * h  ==  n + z * (h - n)
        h_new = n + z * (h - n)
        if needs_mask:
            h_new = jnp.where(base_t + t < t_total, h_new, h)
        return h_new

    h = jax.lax.fori_loop(0, Tc, step, h_ref[...], unroll=unroll)
    h_ref[...] = h

    @pl.when(chunk == n_chunks - 1)
    def _():
        logits = jnp.dot(h.astype(jnp.bfloat16), w_fc_ref[...],
                         preferred_element_type=jnp.float32) + b_fc_ref[...]
        out_ref[...] = logits.astype(out_ref.dtype)


# --------------------------------------------------------------------------- #
# Wrapper
# --------------------------------------------------------------------------- #
def _pick_t_chunk(T, Bp, H3, budget_bytes=8 << 20):
    """Chunk rows so the double-buffered bf16 slab stays well inside VMEM on all gens."""
    per_row = 2 * Bp * H3 * 2          # 2 buffers * Bp * H3 * sizeof(bf16)
    cap = max(8, budget_bytes // per_row)
    return int(min(T, min(cap, 512)))


def comments_classifier_forward(input_ids, packed, *, t_chunk=None, unroll=8):
    """input_ids: (B, T) int32.  Returns (B, num_classes) float32 logits."""
    B, T = input_ids.shape
    Hp = packed["hidden_pad"]
    C = packed["num_classes"]
    H3 = packed["w_h_cat"].shape[1]
    Cp = packed["w_fc"].shape[1]
    Bp = _round_up(B, 8)

    if t_chunk is None:
        t_chunk = _pick_t_chunk(T, Bp, H3)
    num_chunks = pl.cdiv(T, t_chunk)
    T_pad = num_chunks * t_chunk

    # Pad batch BEFORE the gather (token 0 = padding row), gather time-major
    # directly -- avoids materializing a slab-sized transpose in HBM.
    # TODO(synk): the nn.Embedding gather is data-dependent and stays in plain JAX.
    ids = input_ids
    if Bp != B:
        ids = jnp.pad(ids, ((0, Bp - B), (0, 0)))
    i_slab = packed["proj_table"][ids.T]                   # (T, Bp, 3*Hp) bf16
    if T_pad != T:
        i_slab = jnp.pad(i_slab, ((0, T_pad - T), (0, 0), (0, 0)))

    kernel = functools.partial(gru_classifier_kernel,
                               t_total=T, t_chunk=t_chunk, unroll=unroll)

    out = pl.pallas_call(
        kernel,
        out_shape=jax.ShapeDtypeStruct((Bp, Cp), jnp.float32),
        grid=(num_chunks,),
        in_specs=[
            pl.BlockSpec((t_chunk, Bp, H3), lambda t: (t, 0, 0)),  # streamed gate slab
            pl.BlockSpec((Hp, H3), lambda t: (0, 0)),              # fused hidden weights
            pl.BlockSpec((1, Hp), lambda t: (0, 0)),               # b_hn
            pl.BlockSpec((Hp, Cp), lambda t: (0, 0)),              # fc weight
            pl.BlockSpec((1, Cp), lambda t: (0, 0)),               # fc bias
        ],
        out_specs=pl.BlockSpec((Bp, Cp), lambda t: (0, 0)),
        scratch_shapes=[pltpu.VMEM((Bp, Hp), jnp.float32)],        # carried hidden state
        compiler_params=pltpu.CompilerParams(
            dimension_semantics=("arbitrary",),   # serial recurrence over T chunks
        ),
    )(i_slab, packed["w_h_cat"], packed["b_hn"], packed["w_fc"], packed["b_fc"])
    return out[:B, :C]


# --------------------------------------------------------------------------- #
# Parameter init (PyTorch-like raw params) and packing for the kernel
# --------------------------------------------------------------------------- #
def init_params(key, vocab_size, embedding_dim, hidden_size, num_classes):
    ks = jax.random.split(key, 15)
    H, E, C, V = hidden_size, embedding_dim, num_classes, vocab_size
    s = 1.0 / jnp.sqrt(H)

    def u(k, shape):
        return jax.random.uniform(k, shape, jnp.float32, minval=-s, maxval=s)

    emb = jax.random.normal(ks[0], (V, E), jnp.float32)
    emb = emb.at[0].set(0.0)  # padding_idx=0

    return {
        "embedding": emb,
        "w_ir": u(ks[1], (H, E)), "w_iz": u(ks[2], (H, E)), "w_in": u(ks[3], (H, E)),
        "w_hr": u(ks[4], (H, H)), "w_hz": u(ks[5], (H, H)), "w_hn": u(ks[6], (H, H)),
        "b_ir": u(ks[7], (1, H)), "b_iz": u(ks[8], (1, H)), "b_in": u(ks[9], (1, H)),
        "b_hr": u(ks[10], (1, H)), "b_hz": u(ks[11], (1, H)), "b_hn": u(ks[12], (1, H)),
        "w_fc": u(ks[13], (C, H)), "b_fc": u(ks[14], (1, C)),
    }


def pack_params(raw, lane=128):
    """Fuse/pad/cast raw params into the layout the Pallas kernel expects."""
    emb = raw["embedding"]
    V, E = emb.shape
    H = raw["w_hr"].shape[0]
    C = raw["w_fc"].shape[0]
    Hp = _round_up(H, lane)
    Cp = _round_up(C, lane)
    H3 = 3 * Hp
    hi = jax.lax.Precision.HIGHEST

    # Input-to-hidden weights concatenated [r | z | n], each gate Hp lanes wide.
    w_i_cat = jnp.zeros((E, H3), jnp.float32)
    w_i_cat = w_i_cat.at[:, 0 * Hp:0 * Hp + H].set(raw["w_ir"].T)
    w_i_cat = w_i_cat.at[:, 1 * Hp:1 * Hp + H].set(raw["w_iz"].T)
    w_i_cat = w_i_cat.at[:, 2 * Hp:2 * Hp + H].set(raw["w_in"].T)
    # Foldable biases: r/z gates take (b_i + b_h); n keeps b_in here and b_hn
    # stays inside the r*(...) term in the kernel (PyTorch GRU semantics).
    b_i_cat = jnp.zeros((1, H3), jnp.float32)
    b_i_cat = b_i_cat.at[:, 0 * Hp:0 * Hp + H].set(raw["b_ir"] + raw["b_hr"])
    b_i_cat = b_i_cat.at[:, 1 * Hp:1 * Hp + H].set(raw["b_iz"] + raw["b_hz"])
    b_i_cat = b_i_cat.at[:, 2 * Hp:2 * Hp + H].set(raw["b_in"])

    # Pre-projected embedding table (bf16: halves the dominant HBM operand).
    # (Row 0 = zero embedding -> just the folded biases, matching padding_idx=0.)
    proj_table = (jnp.dot(emb, w_i_cat, precision=hi) + b_i_cat).astype(jnp.bfloat16)

    # Fused, padded hidden weights (bf16 for the MXU).
    w_h_cat = jnp.zeros((Hp, H3), jnp.float32)
    w_h_cat = w_h_cat.at[:H, 0 * Hp:0 * Hp + H].set(raw["w_hr"].T)
    w_h_cat = w_h_cat.at[:H, 1 * Hp:1 * Hp + H].set(raw["w_hz"].T)
    w_h_cat = w_h_cat.at[:H, 2 * Hp:2 * Hp + H].set(raw["w_hn"].T)
    w_h_cat = w_h_cat.astype(jnp.bfloat16)

    b_hn = jnp.zeros((1, Hp), jnp.float32).at[:, :H].set(raw["b_hn"])

    w_fc = jnp.zeros((Hp, Cp), jnp.float32).at[:H, :C].set(raw["w_fc"].T)
    w_fc = w_fc.astype(jnp.bfloat16)
    b_fc = jnp.zeros((1, Cp), jnp.float32).at[:, :C].set(raw["b_fc"])

    return {
        "proj_table": proj_table, "w_h_cat": w_h_cat, "b_hn": b_hn,
        "w_fc": w_fc, "b_fc": b_fc,
        "hidden_pad": Hp, "hidden_size": H, "num_classes": C,
    }


# --------------------------------------------------------------------------- #
# References
# --------------------------------------------------------------------------- #
def reference_forward_f32(input_ids, raw):
    """Pure-f32 PyTorch-style forward (the module semantics)."""
    hi = jax.lax.Precision.HIGHEST
    emb = raw["embedding"][input_ids]              # (B, T, E)
    B = emb.shape[0]
    H = raw["w_hr"].shape[0]
    h = jnp.zeros((B, H), jnp.float32)

    def step(h, x_t):
        i_r = jnp.dot(x_t, raw["w_ir"].T, precision=hi) + raw["b_ir"]
        i_z = jnp.dot(x_t, raw["w_iz"].T, precision=hi) + raw["b_iz"]
        i_n = jnp.dot(x_t, raw["w_in"].T, precision=hi) + raw["b_in"]
        h_r = jnp.dot(h, raw["w_hr"].T, precision=hi) + raw["b_hr"]
        h_z = jnp.dot(h, raw["w_hz"].T, precision=hi) + raw["b_hz"]
        h_n = jnp.dot(h, raw["w_hn"].T, precision=hi) + raw["b_hn"]
        r = jax.nn.sigmoid(i_r + h_r)
        z = jax.nn.sigmoid(i_z + h_z)
        n = jnp.tanh(i_n + r * h_n)
        return (1.0 - z) * n + z * h, None

    h_last, _ = jax.lax.scan(step, h, jnp.transpose(emb, (1, 0, 2)))
    return jnp.dot(h_last, raw["w_fc"].T, precision=hi) + raw["b_fc"]


def reference_forward_packed(input_ids, packed):
    """Plain-JAX replica of the fused/padded/bf16 arithmetic the kernel runs."""
    Hp = packed["hidden_pad"]
    C = packed["num_classes"]
    B, T = input_ids.shape
    gi_all = packed["proj_table"][input_ids]              # (B, T, 3*Hp) bf16
    h = jnp.zeros((B, Hp), jnp.float32)

    def step(h, gi):
        gi = gi.astype(jnp.float32)
        gh = jnp.dot(h.astype(jnp.bfloat16), packed["w_h_cat"],
                     preferred_element_type=jnp.float32)
        r = jax.nn.sigmoid(gi[:, 0 * Hp:1 * Hp] + gh[:, 0 * Hp:1 * Hp])
        z = jax.nn.sigmoid(gi[:, 1 * Hp:2 * Hp] + gh[:, 1 * Hp:2 * Hp])
        n = jnp.tanh(gi[:, 2 * Hp:3 * Hp] + r * (gh[:, 2 * Hp:3 * Hp] + packed["b_hn"]))
        return n + z * (h - n), None

    h_last, _ = jax.lax.scan(step, h, jnp.transpose(gi_all, (1, 0, 2)))
    logits = jnp.dot(h_last.astype(jnp.bfloat16), packed["w_fc"],
                     preferred_element_type=jnp.float32) + packed["b_fc"]
    return logits[:, :C]


# --------------------------------------------------------------------------- #
# Demo / self-check
# --------------------------------------------------------------------------- #
if __name__ == "__main__":
    vocab_size, embedding_dim, hidden_size, num_classes = 50, 16, 32, 4
    batch, seq_len = 2, 8

    key = jax.random.PRNGKey(0)
    k_param, k_ids = jax.random.split(key)
    raw = init_params(k_param, vocab_size, embedding_dim, hidden_size, num_classes)
    packed = pack_params(raw)

    input_ids = jax.random.randint(k_ids, (batch, seq_len), 0, vocab_size, jnp.int32)

    # Default path (single chunk at this T).
    logits = comments_classifier_forward(input_ids, packed)
    logits = jax.block_until_ready(logits)
    assert logits.shape == (batch, num_classes)

    # Multi-chunk path, including the non-divisible-T masking (T=8, t_chunk=3).
    logits_chunked = comments_classifier_forward(input_ids, packed, t_chunk=3)
    logits_chunked = jax.block_until_ready(logits_chunked)

    # Tight check: same fused/padded/bf16 arithmetic computed in plain JAX.
    ref_packed = reference_forward_packed(input_ids, packed)
    for name, got in (("default", logits), ("chunked", logits_chunked)):
        assert jnp.allclose(got, ref_packed, atol=5e-3, rtol=5e-3), (
            f"kernel({name}) vs packed ref max |diff| = "
            f"{float(jnp.max(jnp.abs(got - ref_packed)))}")

    # Semantics check vs the pure-f32 PyTorch-style forward (bf16 slab + bf16
    # MXU weights introduce a small, bounded deviation).
    ref_f32 = reference_forward_f32(input_ids, raw)
    assert jnp.allclose(logits, ref_f32, atol=5e-2, rtol=5e-2), (
        "kernel vs f32 ref max |diff| = "
        f"{float(jnp.max(jnp.abs(logits - ref_f32)))}")

    print("KERNEL_OK")
</pallas_src>

<mosaic_0001>
module attributes {stable_mosaic.version = 11 : i64} {
  func.func @gru_classifier_kernel(%arg0: i32, %arg1: memref<8x8x384xbf16, #tpu.memory_space<vmem>>, %arg2: memref<128x384xbf16, #tpu.memory_space<vmem>>, %arg3: memref<1x128xf32, #tpu.memory_space<vmem>>, %arg4: memref<128x128xbf16, #tpu.memory_space<vmem>>, %arg5: memref<1x128xf32, #tpu.memory_space<vmem>>, %arg6: memref<8x128xf32, #tpu.memory_space<vmem>>, %arg7: memref<8x128xf32, #tpu.memory_space<vmem>>) attributes {dimension_semantics = [#tpu.dimension_semantics<arbitrary>], iteration_bounds = array<i64: 1>, scalar_prefetch = 0 : i64, scratch_operands = 1 : i64, tpu.core_type = #tpu.core_type<tc>, window_params = [{transform_indices = @transform_0, window_bounds = array<i64: 8, 8, 384>}, {pipeline_mode = #tpu.pipeline_mode<synchronous>, transform_indices = @transform_1, window_bounds = array<i64: 128, 384>}, {pipeline_mode = #tpu.pipeline_mode<synchronous>, transform_indices = @transform_2, window_bounds = array<i64: 1, 128>}, {pipeline_mode = #tpu.pipeline_mode<synchronous>, transform_indices = @transform_3, window_bounds = array<i64: 128, 128>}, {pipeline_mode = #tpu.pipeline_mode<synchronous>, transform_indices = @transform_4, window_bounds = array<i64: 1, 128>}, {pipeline_mode = #tpu.pipeline_mode<synchronous>, transform_indices = @transform_5, window_bounds = array<i64: 8, 128>}]} {
    %c0_i32 = arith.constant 0 : i32
    %0 = arith.cmpi eq, %arg0, %c0_i32 : i32
    %1 = arith.extui %0 : i1 to i32
    %c0_i32_0 = arith.constant 0 : i32
    %2 = arith.cmpi ne, %1, %c0_i32_0 : i32
    scf.if %2 {
      %cst_50 = arith.constant 0.000000e+00 : f32
      %260 = vector.broadcast %cst_50 : f32 to vector<8x128xf32>
      %c0_51 = arith.constant 0 : index
      %c0_52 = arith.constant 0 : index
      %261 = vector.load %arg7[%c0_51, %c0_52] : memref<8x128xf32, #tpu.memory_space<vmem>>, vector<8x128xf32>
      tpu.vector_store %arg7[%c0_51, %c0_52], %260 {strides = array<i32>} : memref<8x128xf32, #tpu.memory_space<vmem>>, vector<8x128xf32>,
    } else {
    }
    %c0 = arith.constant 0 : index
    %c0_1 = arith.constant 0 : index
    %3 = vector.load %arg2[%c0, %c0_1] : memref<128x384xbf16, #tpu.memory_space<vmem>>, vector<128x384xbf16>
    %c0_2 = arith.constant 0 : index
    %c0_3 = arith.constant 0 : index
    %4 = vector.load %arg3[%c0_2, %c0_3] : memref<1x128xf32, #tpu.memory_space<vmem>>, vector<1x128xf32>
    %5 = vector.shape_cast %4 : vector<1x128xf32> to vector<1x128xf32>
    %6 = vector.broadcast %5 : vector<1x128xf32> to vector<8x128xf32>
    %c0_4 = arith.constant 0 : index
    %c0_5 = arith.constant 0 : index
    %7 = vector.load %arg7[%c0_4, %c0_5] : memref<8x128xf32, #tpu.memory_space<vmem>>, vector<8x128xf32>
    %c0_i32_6 = arith.constant 0 : i32
    %8 = arith.index_cast %c0_i32_6 : i32 to index
    %c0_7 = arith.constant 0 : index
    %c0_8 = arith.constant 0 : index
    %9 = vector.load %arg1[%8, %c0_7, %c0_8] : memref<8x8x384xbf16, #tpu.memory_space<vmem>>, vector<1x8x384xbf16>
    %10 = vector.shape_cast %9 : vector<1x8x384xbf16> to vector<8x384xbf16>
    %11 = arith.extf %10 : vector<8x384xbf16> to vector<8x384xf32>
    %12 = arith.truncf %7 : vector<8x128xf32> to vector<8x128xbf16>
    %cst = arith.constant dense<0.000000e+00> : vector<8x384xf32>
    %13 = tpu.matmul %12, %3, %cst {dimension_numbers = #tpu.dot_dimension_numbers<[1], [0], [0], [1], [0, 0, 1, 1], [], []>} : vector<8x128xbf16>, vector<128x384xbf16>, vector<8x384xf32> -> vector<8x384xf32>
    %14 = vector.extract_strided_slice %11 {offsets = [0, 0], sizes = [8, 128], strides = [1, 1]} : vector<8x384xf32> to vector<8x128xf32>
    %15 = vector.extract_strided_slice %13 {offsets = [0, 0], sizes = [8, 128], strides = [1, 1]} : vector<8x384xf32> to vector<8x128xf32>
    %16 = arith.addf %14, %15 : vector<8x128xf32>
    %17 = arith.negf %16 : vector<8x128xf32>
    %18 = math.exp %17 : vector<8x128xf32>
    %cst_9 = arith.constant 1.000000e+00 : f32
    %19 = vector.broadcast %cst_9 : f32 to vector<8x128xf32>
    %20 = arith.addf %19, %18 : vector<8x128xf32>
    %21 = arith.divf %19, %20 : vector<8x128xf32>
    %22 = vector.extract_strided_slice %11 {offsets = [0, 128], sizes = [8, 128], strides = [1, 1]} : vector<8x384xf32> to vector<8x128xf32>
    %23 = vector.extract_strided_slice %13 {offsets = [0, 128], sizes = [8, 128], strides = [1, 1]} : vector<8x384xf32> to vector<8x128xf32>
    %24 = arith.addf %22, %23 : vector<8x128xf32>
    %25 = arith.negf %24 : vector<8x128xf32>
    %26 = math.exp %25 : vector<8x128xf32>
    %cst_10 = arith.constant 1.000000e+00 : f32
    %27 = vector.broadcast %cst_10 : f32 to vector<8x128xf32>
    %28 = arith.addf %27, %26 : vector<8x128xf32>
    %29 = arith.divf %27, %28 : vector<8x128xf32>
    %30 = vector.extract_strided_slice %11 {offsets = [0, 256], sizes = [8, 128], strides = [1, 1]} : vector<8x384xf32> to vector<8x128xf32>
    %31 = vector.extract_strided_slice %13 {offsets = [0, 256], sizes = [8, 128], strides = [1, 1]} : vector<8x384xf32> to vector<8x128xf32>
    %32 = arith.addf %31, %6 : vector<8x128xf32>
    %33 = arith.mulf %21, %32 : vector<8x128xf32>
    %34 = arith.addf %30, %33 : vector<8x128xf32>
    %35 = math.tanh %34 : vector<8x128xf32>
    %36 = arith.subf %7, %35 : vector<8x128xf32>
    %37 = arith.mulf %29, %36 : vector<8x128xf32>
    %38 = arith.addf %35, %37 : vector<8x128xf32>
    %c1_i32 = arith.constant 1 : i32
    %39 = arith.index_cast %c1_i32 : i32 to index
    %c0_11 = arith.constant 0 : index
    %c0_12 = arith.constant 0 : index
    %40 = vector.load %arg1[%39, %c0_11, %c0_12] : memref<8x8x384xbf16, #tpu.memory_space<vmem>>, vector<1x8x384xbf16>
    %41 = vector.shape_cast %40 : vector<1x8x384xbf16> to vector<8x384xbf16>
    %42 = arith.extf %41 : vector<8x384xbf16> to vector<8x384xf32>
    %43 = arith.truncf %38 : vector<8x128xf32> to vector<8x128xbf16>
    %cst_13 = arith.constant dense<0.000000e+00> : vector<8x384xf32>
    %44 = tpu.matmul %43, %3, %cst_13 {dimension_numbers = #tpu.dot_dimension_numbers<[1], [0], [0], [1], [0, 0, 1, 1], [], []>} : vector<8x128xbf16>, vector<128x384xbf16>, vector<8x384xf32> -> vector<8x384xf32>
    %45 = vector.extract_strided_slice %42 {offsets = [0, 0], sizes = [8, 128], strides = [1, 1]} : vector<8x384xf32> to vector<8x128xf32>
    %46 = vector.extract_strided_slice %44 {offsets = [0, 0], sizes = [8, 128], strides = [1, 1]} : vector<8x384xf32> to vector<8x128xf32>
    %47 = arith.addf %45, %46 : vector<8x128xf32>
    %48 = arith.negf %47 : vector<8x128xf32>
    %49 = math.exp %48 : vector<8x128xf32>
    %cst_14 = arith.constant 1.000000e+00 : f32
    %50 = vector.broadcast %cst_14 : f32 to vector<8x128xf32>
    %51 = arith.addf %50, %49 : vector<8x128xf32>
    %52 = arith.divf %50, %51 : vector<8x128xf32>
    %53 = vector.extract_strided_slice %42 {offsets = [0, 128], sizes = [8, 128], strides = [1, 1]} : vector<8x384xf32> to vector<8x128xf32>
    %54 = vector.extract_strided_slice %44 {offsets = [0, 128], sizes = [8, 128], strides = [1, 1]} : vector<8x384xf32> to vector<8x128xf32>
    %55 = arith.addf %53, %54 : vector<8x128xf32>
    %56 = arith.negf %55 : vector<8x128xf32>
    %57 = math.exp %56 : vector<8x128xf32>
    %cst_15 = arith.constant 1.000000e+00 : f32
    %58 = vector.broadcast %cst_15 : f32 to vector<8x128xf32>
    %59 = arith.addf %58, %57 : vector<8x128xf32>
    %60 = arith.divf %58, %59 : vector<8x128xf32>
    %61 = vector.extract_strided_slice %42 {offsets = [0, 256], sizes = [8, 128], strides = [1, 1]} : vector<8x384xf32> to vector<8x128xf32>
    %62 = vector.extract_strided_slice %44 {offsets = [0, 256], sizes = [8, 128], strides = [1, 1]} : vector<8x384xf32> to vector<8x128xf32>
    %63 = arith.addf %62, %6 : vector<8x128xf32>
    %64 = arith.mulf %52, %63 : vector<8x128xf32>
    %65 = arith.addf %61, %64 : vector<8x128xf32>
    %66 = math.tanh %65 : vector<8x128xf32>
    %67 = arith.subf %38, %66 : vector<8x128xf32>
    %68 = arith.mulf %60, %67 : vector<8x128xf32>
    %69 = arith.addf %66, %68 : vector<8x128xf32>
    %c2_i32 = arith.constant 2 : i32
    %70 = arith.index_cast %c2_i32 : i32 to index
    %c0_16 = arith.constant 0 : index
    %c0_17 = arith.constant 0 : index
    %71 = vector.load %arg1[%70, %c0_16, %c0_17] : memref<8x8x384xbf16, #tpu.memory_space<vmem>>, vector<1x8x384xbf16>
    %72 = vector.shape_cast %71 : vector<1x8x384xbf16> to vector<8x384xbf16>
    %73 = arith.extf %72 : vector<8x384xbf16> to vector<8x384xf32>
    %74 = arith.truncf %69 : vector<8x128xf32> to vector<8x128xbf16>
    %cst_18 = arith.constant dense<0.000000e+00> : vector<8x384xf32>
    %75 = tpu.matmul %74, %3, %cst_18 {dimension_numbers = #tpu.dot_dimension_numbers<[1], [0], [0], [1], [0, 0, 1, 1], [], []>} : vector<8x128xbf16>, vector<128x384xbf16>, vector<8x384xf32> -> vector<8x384xf32>
    %76 = vector.extract_strided_slice %73 {offsets = [0, 0], sizes = [8, 128], strides = [1, 1]} : vector<8x384xf32> to vector<8x128xf32>
    %77 = vector.extract_strided_slice %75 {offsets = [0, 0], sizes = [8, 128], strides = [1, 1]} : vector<8x384xf32> to vector<8x128xf32>
    %78 = arith.addf %76, %77 : vector<8x128xf32>
    %79 = arith.negf %78 : vector<8x128xf32>
    %80 = math.exp %79 : vector<8x128xf32>
    %cst_19 = arith.constant 1.000000e+00 : f32
    %81 = vector.broadcast %cst_19 : f32 to vector<8x128xf32>
    %82 = arith.addf %81, %80 : vector<8x128xf32>
    %83 = arith.divf %81, %82 : vector<8x128xf32>
    %84 = vector.extract_strided_slice %73 {offsets = [0, 128], sizes = [8, 128], strides = [1, 1]} : vector<8x384xf32> to vector<8x128xf32>
    %85 = vector.extract_strided_slice %75 {offsets = [0, 128], sizes = [8, 128], strides = [1, 1]} : vector<8x384xf32> to vector<8x128xf32>
    %86 = arith.addf %84, %85 : vector<8x128xf32>
    %87 = arith.negf %86 : vector<8x128xf32>
    %88 = math.exp %87 : vector<8x128xf32>
    %cst_20 = arith.constant 1.000000e+00 : f32
    %89 = vector.broadcast %cst_20 : f32 to vector<8x128xf32>
    %90 = arith.addf %89, %88 : vector<8x128xf32>
    %91 = arith.divf %89, %90 : vector<8x128xf32>
    %92 = vector.extract_strided_slice %73 {offsets = [0, 256], sizes = [8, 128], strides = [1, 1]} : vector<8x384xf32> to vector<8x128xf32>
    %93 = vector.extract_strided_slice %75 {offsets = [0, 256], sizes = [8, 128], strides = [1, 1]} : vector<8x384xf32> to vector<8x128xf32>
    %94 = arith.addf %93, %6 : vector<8x128xf32>
    %95 = arith.mulf %83, %94 : vector<8x128xf32>
    %96 = arith.addf %92, %95 : vector<8x128xf32>
    %97 = math.tanh %96 : vector<8x128xf32>
    %98 = arith.subf %69, %97 : vector<8x128xf32>
    %99 = arith.mulf %91, %98 : vector<8x128xf32>
    %100 = arith.addf %97, %99 : vector<8x128xf32>
    %c3_i32 = arith.constant 3 : i32
    %101 = arith.index_cast %c3_i32 : i32 to index
    %c0_21 = arith.constant 0 : index
    %c0_22 = arith.constant 0 : index
    %102 = vector.load %arg1[%101, %c0_21, %c0_22] : memref<8x8x384xbf16, #tpu.memory_space<vmem>>, vector<1x8x384xbf16>
    %103 = vector.shape_cast %102 : vector<1x8x384xbf16> to vector<8x384xbf16>
    %104 = arith.extf %103 : vector<8x384xbf16> to vector<8x384xf32>
    %105 = arith.truncf %100 : vector<8x128xf32> to vector<8x128xbf16>
    %cst_23 = arith.constant dense<0.000000e+00> : vector<8x384xf32>
    %106 = tpu.matmul %105, %3, %cst_23 {dimension_numbers = #tpu.dot_dimension_numbers<[1], [0], [0], [1], [0, 0, 1, 1], [], []>} : vector<8x128xbf16>, vector<128x384xbf16>, vector<8x384xf32> -> vector<8x384xf32>
    %107 = vector.extract_strided_slice %104 {offsets = [0, 0], sizes = [8, 128], strides = [1, 1]} : vector<8x384xf32> to vector<8x128xf32>
    %108 = vector.extract_strided_slice %106 {offsets = [0, 0], sizes = [8, 128], strides = [1, 1]} : vector<8x384xf32> to vector<8x128xf32>
    %109 = arith.addf %107, %108 : vector<8x128xf32>
    %110 = arith.negf %109 : vector<8x128xf32>
    %111 = math.exp %110 : vector<8x128xf32>
    %cst_24 = arith.constant 1.000000e+00 : f32
    %112 = vector.broadcast %cst_24 : f32 to vector<8x128xf32>
    %113 = arith.addf %112, %111 : vector<8x128xf32>
    %114 = arith.divf %112, %113 : vector<8x128xf32>
    %115 = vector.extract_strided_slice %104 {offsets = [0, 128], sizes = [8, 128], strides = [1, 1]} : vector<8x384xf32> to vector<8x128xf32>
    %116 = vector.extract_strided_slice %106 {offsets = [0, 128], sizes = [8, 128], strides = [1, 1]} : vector<8x384xf32> to vector<8x128xf32>
    %117 = arith.addf %115, %116 : vector<8x128xf32>
    %118 = arith.negf %117 : vector<8x128xf32>
    %119 = math.exp %118 : vector<8x128xf32>
    %cst_25 = arith.constant 1.000000e+00 : f32
    %120 = vector.broadcast %cst_25 : f32 to vector<8x128xf32>
    %121 = arith.addf %120, %119 : vector<8x128xf32>
    %122 = arith.divf %120, %121 : vector<8x128xf32>
    %123 = vector.extract_strided_slice %104 {offsets = [0, 256], sizes = [8, 128], strides = [1, 1]} : vector<8x384xf32> to vector<8x128xf32>
    %124 = vector.extract_strided_slice %106 {offsets = [0, 256], sizes = [8, 128], strides = [1, 1]} : vector<8x384xf32> to vector<8x128xf32>
    %125 = arith.addf %124, %6 : vector<8x128xf32>
    %126 = arith.mulf %114, %125 : vector<8x128xf32>
    %127 = arith.addf %123, %126 : vector<8x128xf32>
    %128 = math.tanh %127 : vector<8x128xf32>
    %129 = arith.subf %100, %128 : vector<8x128xf32>
    %130 = arith.mulf %122, %129 : vector<8x128xf32>
    %131 = arith.addf %128, %130 : vector<8x128xf32>
    %c4_i32 = arith.constant 4 : i32
    %132 = arith.index_cast %c4_i32 : i32 to index
    %c0_26 = arith.constant 0 : index
    %c0_27 = arith.constant 0 : index
    %133 = vector.load %arg1[%132, %c0_26, %c0_27] : memref<8x8x384xbf16, #tpu.memory_space<vmem>>, vector<1x8x384xbf16>
    %134 = vector.shape_cast %133 : vector<1x8x384xbf16> to vector<8x384xbf16>
    %135 = arith.extf %134 : vector<8x384xbf16> to vector<8x384xf32>
    %136 = arith.truncf %131 : vector<8x128xf32> to vector<8x128xbf16>
    %cst_28 = arith.constant dense<0.000000e+00> : vector<8x384xf32>
    %137 = tpu.matmul %136, %3, %cst_28 {dimension_numbers = #tpu.dot_dimension_numbers<[1], [0], [0], [1], [0, 0, 1, 1], [], []>} : vector<8x128xbf16>, vector<128x384xbf16>, vector<8x384xf32> -> vector<8x384xf32>
    %138 = vector.extract_strided_slice %135 {offsets = [0, 0], sizes = [8, 128], strides = [1, 1]} : vector<8x384xf32> to vector<8x128xf32>
    %139 = vector.extract_strided_slice %137 {offsets = [0, 0], sizes = [8, 128], strides = [1, 1]} : vector<8x384xf32> to vector<8x128xf32>
    %140 = arith.addf %138, %139 : vector<8x128xf32>
    %141 = arith.negf %140 : vector<8x128xf32>
    %142 = math.exp %141 : vector<8x128xf32>
    %cst_29 = arith.constant 1.000000e+00 : f32
    %143 = vector.broadcast %cst_29 : f32 to vector<8x128xf32>
    %144 = arith.addf %143, %142 : vector<8x128xf32>
    %145 = arith.divf %143, %144 : vector<8x128xf32>
    %146 = vector.extract_strided_slice %135 {offsets = [0, 128], sizes = [8, 128], strides = [1, 1]} : vector<8x384xf32> to vector<8x128xf32>
    %147 = vector.extract_strided_slice %137 {offsets = [0, 128], sizes = [8, 128], strides = [1, 1]} : vector<8x384xf32> to vector<8x128xf32>
    %148 = arith.addf %146, %147 : vector<8x128xf32>
    %149 = arith.negf %148 : vector<8x128xf32>
    %150 = math.exp %149 : vector<8x128xf32>
    %cst_30 = arith.constant 1.000000e+00 : f32
    %151 = vector.broadcast %cst_30 : f32 to vector<8x128xf32>
    %152 = arith.addf %151, %150 : vector<8x128xf32>
    %153 = arith.divf %151, %152 : vector<8x128xf32>
    %154 = vector.extract_strided_slice %135 {offsets = [0, 256], sizes = [8, 128], strides = [1, 1]} : vector<8x384xf32> to vector<8x128xf32>
    %155 = vector.extract_strided_slice %137 {offsets = [0, 256], sizes = [8, 128], strides = [1, 1]} : vector<8x384xf32> to vector<8x128xf32>
    %156 = arith.addf %155, %6 : vector<8x128xf32>
    %157 = arith.mulf %145, %156 : vector<8x128xf32>
    %158 = arith.addf %154, %157 : vector<8x128xf32>
    %159 = math.tanh %158 : vector<8x128xf32>
    %160 = arith.subf %131, %159 : vector<8x128xf32>
    %161 = arith.mulf %153, %160 : vector<8x128xf32>
    %162 = arith.addf %159, %161 : vector<8x128xf32>
    %c5_i32 = arith.constant 5 : i32
    %163 = arith.index_cast %c5_i32 : i32 to index
    %c0_31 = arith.constant 0 : index
    %c0_32 = arith.constant 0 : index
    %164 = vector.load %arg1[%163, %c0_31, %c0_32] : memref<8x8x384xbf16, #tpu.memory_space<vmem>>, vector<1x8x384xbf16>
    %165 = vector.shape_cast %164 : vector<1x8x384xbf16> to vector<8x384xbf16>
    %166 = arith.extf %165 : vector<8x384xbf16> to vector<8x384xf32>
    %167 = arith.truncf %162 : vector<8x128xf32> to vector<8x128xbf16>
    %cst_33 = arith.constant dense<0.000000e+00> : vector<8x384xf32>
    %168 = tpu.matmul %167, %3, %cst_33 {dimension_numbers = #tpu.dot_dimension_numbers<[1], [0], [0], [1], [0, 0, 1, 1], [], []>} : vector<8x128xbf16>, vector<128x384xbf16>, vector<8x384xf32> -> vector<8x384xf32>
    %169 = vector.extract_strided_slice %166 {offsets = [0, 0], sizes = [8, 128], strides = [1, 1]} : vector<8x384xf32> to vector<8x128xf32>
    %170 = vector.extract_strided_slice %168 {offsets = [0, 0], sizes = [8, 128], strides = [1, 1]} : vector<8x384xf32> to vector<8x128xf32>
    %171 = arith.addf %169, %170 : vector<8x128xf32>
    %172 = arith.negf %171 : vector<8x128xf32>
    %173 = math.exp %172 : vector<8x128xf32>
    %cst_34 = arith.constant 1.000000e+00 : f32
    %174 = vector.broadcast %cst_34 : f32 to vector<8x128xf32>
    %175 = arith.addf %174, %173 : vector<8x128xf32>
    %176 = arith.divf %174, %175 : vector<8x128xf32>
    %177 = vector.extract_strided_slice %166 {offsets = [0, 128], sizes = [8, 128], strides = [1, 1]} : vector<8x384xf32> to vector<8x128xf32>
    %178 = vector.extract_strided_slice %168 {offsets = [0, 128], sizes = [8, 128], strides = [1, 1]} : vector<8x384xf32> to vector<8x128xf32>
    %179 = arith.addf %177, %178 : vector<8x128xf32>
    %180 = arith.negf %179 : vector<8x128xf32>
    %181 = math.exp %180 : vector<8x128xf32>
    %cst_35 = arith.constant 1.000000e+00 : f32
    %182 = vector.broadcast %cst_35 : f32 to vector<8x128xf32>
    %183 = arith.addf %182, %181 : vector<8x128xf32>
    %184 = arith.divf %182, %183 : vector<8x128xf32>
    %185 = vector.extract_strided_slice %166 {offsets = [0, 256], sizes = [8, 128], strides = [1, 1]} : vector<8x384xf32> to vector<8x128xf32>
    %186 = vector.extract_strided_slice %168 {offsets = [0, 256], sizes = [8, 128], strides = [1, 1]} : vector<8x384xf32> to vector<8x128xf32>
    %187 = arith.addf %186, %6 : vector<8x128xf32>
    %188 = arith.mulf %176, %187 : vector<8x128xf32>
    %189 = arith.addf %185, %188 : vector<8x128xf32>
    %190 = math.tanh %189 : vector<8x128xf32>
    %191 = arith.subf %162, %190 : vector<8x128xf32>
    %192 = arith.mulf %184, %191 : vector<8x128xf32>
    %193 = arith.addf %190, %192 : vector<8x128xf32>
    %c6_i32 = arith.constant 6 : i32
    %194 = arith.index_cast %c6_i32 : i32 to index
    %c0_36 = arith.constant 0 : index
    %c0_37 = arith.constant 0 : index
    %195 = vector.load %arg1[%194, %c0_36, %c0_37] : memref<8x8x384xbf16, #tpu.memory_space<vmem>>, vector<1x8x384xbf16>
    %196 = vector.shape_cast %195 : vector<1x8x384xbf16> to vector<8x384xbf16>
    %197 = arith.extf %196 : vector<8x384xbf16> to vector<8x384xf32>
    %198 = arith.truncf %193 : vector<8x128xf32> to vector<8x128xbf16>
    %cst_38 = arith.constant dense<0.000000e+00> : vector<8x384xf32>
    %199 = tpu.matmul %198, %3, %cst_38 {dimension_numbers = #tpu.dot_dimension_numbers<[1], [0], [0], [1], [0, 0, 1, 1], [], []>} : vector<8x128xbf16>, vector<128x384xbf16>, vector<8x384xf32> -> vector<8x384xf32>
    %200 = vector.extract_strided_slice %197 {offsets = [0, 0], sizes = [8, 128], strides = [1, 1]} : vector<8x384xf32> to vector<8x128xf32>
    %201 = vector.extract_strided_slice %199 {offsets = [0, 0], sizes = [8, 128], strides = [1, 1]} : vector<8x384xf32> to vector<8x128xf32>
    %202 = arith.addf %200, %201 : vector<8x128xf32>
    %203 = arith.negf %202 : vector<8x128xf32>
    %204 = math.exp %203 : vector<8x128xf32>
    %cst_39 = arith.constant 1.000000e+00 : f32
    %205 = vector.broadcast %cst_39 : f32 to vector<8x128xf32>
    %206 = arith.addf %205, %204 : vector<8x128xf32>
    %207 = arith.divf %205, %206 : vector<8x128xf32>
    %208 = vector.extract_strided_slice %197 {offsets = [0, 128], sizes = [8, 128], strides = [1, 1]} : vector<8x384xf32> to vector<8x128xf32>
    %209 = vector.extract_strided_slice %199 {offsets = [0, 128], sizes = [8, 128], strides = [1, 1]} : vector<8x384xf32> to vector<8x128xf32>
    %210 = arith.addf %208, %209 : vector<8x128xf32>
    %211 = arith.negf %210 : vector<8x128xf32>
    %212 = math.exp %211 : vector<8x128xf32>
    %cst_40 = arith.constant 1.000000e+00 : f32
    %213 = vector.broadcast %cst_40 : f32 to vector<8x128xf32>
    %214 = arith.addf %213, %212 : vector<8x128xf32>
    %215 = arith.divf %213, %214 : vector<8x128xf32>
    %216 = vector.extract_strided_slice %197 {offsets = [0, 256], sizes = [8, 128], strides = [1, 1]} : vector<8x384xf32> to vector<8x128xf32>
    %217 = vector.extract_strided_slice %199 {offsets = [0, 256], sizes = [8, 128], strides = [1, 1]} : vector<8x384xf32> to vector<8x128xf32>
    %218 = arith.addf %217, %6 : vector<8x128xf32>
    %219 = arith.mulf %207, %218 : vector<8x128xf32>
    %220 = arith.addf %216, %219 : vector<8x128xf32>
    %221 = math.tanh %220 : vector<8x128xf32>
    %222 = arith.subf %193, %221 : vector<8x128xf32>
    %223 = arith.mulf %215, %222 : vector<8x128xf32>
    %224 = arith.addf %221, %223 : vector<8x128xf32>
    %c7_i32 = arith.constant 7 : i32
    %225 = arith.index_cast %c7_i32 : i32 to index
    %c0_41 = arith.constant 0 : index
    %c0_42 = arith.constant 0 : index
    %226 = vector.load %arg1[%225, %c0_41, %c0_42] : memref<8x8x384xbf16, #tpu.memory_space<vmem>>, vector<1x8x384xbf16>
    %227 = vector.shape_cast %226 : vector<1x8x384xbf16> to vector<8x384xbf16>
    %228 = arith.extf %227 : vector<8x384xbf16> to vector<8x384xf32>
    %229 = arith.truncf %224 : vector<8x128xf32> to vector<8x128xbf16>
    %cst_43 = arith.constant dense<0.000000e+00> : vector<8x384xf32>
    %230 = tpu.matmul %229, %3, %cst_43 {dimension_numbers = #tpu.dot_dimension_numbers<[1], [0], [0], [1], [0, 0, 1, 1], [], []>} : vector<8x128xbf16>, vector<128x384xbf16>, vector<8x384xf32> -> vector<8x384xf32>
    %231 = vector.extract_strided_slice %228 {offsets = [0, 0], sizes = [8, 128], strides = [1, 1]} : vector<8x384xf32> to vector<8x128xf32>
    %232 = vector.extract_strided_slice %230 {offsets = [0, 0], sizes = [8, 128], strides = [1, 1]} : vector<8x384xf32> to vector<8x128xf32>
    %233 = arith.addf %231, %232 : vector<8x128xf32>
    %234 = arith.negf %233 : vector<8x128xf32>
    %235 = math.exp %234 : vector<8x128xf32>
    %cst_44 = arith.constant 1.000000e+00 : f32
    %236 = vector.broadcast %cst_44 : f32 to vector<8x128xf32>
    %237 = arith.addf %236, %235 : vector<8x128xf32>
    %238 = arith.divf %236, %237 : vector<8x128xf32>
    %239 = vector.extract_strided_slice %228 {offsets = [0, 128], sizes = [8, 128], strides = [1, 1]} : vector<8x384xf32> to vector<8x128xf32>
    %240 = vector.extract_strided_slice %230 {offsets = [0, 128], sizes = [8, 128], strides = [1, 1]} : vector<8x384xf32> to vector<8x128xf32>
    %241 = arith.addf %239, %240 : vector<8x128xf32>
    %242 = arith.negf %241 : vector<8x128xf32>
    %243 = math.exp %242 : vector<8x128xf32>
    %cst_45 = arith.constant 1.000000e+00 : f32
    %244 = vector.broadcast %cst_45 : f32 to vector<8x128xf32>
    %245 = arith.addf %244, %243 : vector<8x128xf32>
    %246 = arith.divf %244, %245 : vector<8x128xf32>
    %247 = vector.extract_strided_slice %228 {offsets = [0, 256], sizes = [8, 128], strides = [1, 1]} : vector<8x384xf32> to vector<8x128xf32>
    %248 = vector.extract_strided_slice %230 {offsets = [0, 256], sizes = [8, 128], strides = [1, 1]} : vector<8x384xf32> to vector<8x128xf32>
    %249 = arith.addf %248, %6 : vector<8x128xf32>
    %250 = arith.mulf %238, %249 : vector<8x128xf32>
    %251 = arith.addf %247, %250 : vector<8x128xf32>
    %252 = math.tanh %251 : vector<8x128xf32>
    %253 = arith.subf %224, %252 : vector<8x128xf32>
    %254 = arith.mulf %246, %253 : vector<8x128xf32>
    %255 = arith.addf %252, %254 : vector<8x128xf32>
    %c8_i32 = arith.constant 8 : i32
    %c0_46 = arith.constant 0 : index
    %c0_47 = arith.constant 0 : index
    %256 = vector.load %arg7[%c0_46, %c0_47] : memref<8x128xf32, #tpu.memory_space<vmem>>, vector<8x128xf32>
    tpu.vector_store %arg7[%c0_46, %c0_47], %255 {strides = array<i32>} : memref<8x128xf32, #tpu.memory_space<vmem>>, vector<8x128xf32>,
    %c0_i32_48 = arith.constant 0 : i32
    %257 = arith.cmpi eq, %arg0, %c0_i32_48 : i32
    %258 = arith.extui %257 : i1 to i32
    %c0_i32_49 = arith.constant 0 : i32
    %259 = arith.cmpi ne, %258, %c0_i32_49 : i32
    scf.if %259 {
      %260 = arith.truncf %255 : vector<8x128xf32> to vector<8x128xbf16>
      %c0_50 = arith.constant 0 : index
      %c0_51 = arith.constant 0 : index
      %261 = vector.load %arg4[%c0_50, %c0_51] : memref<128x128xbf16, #tpu.memory_space<vmem>>, vector<128x128xbf16>
      %cst_52 = arith.constant dense<0.000000e+00> : vector<8x128xf32>
      %262 = tpu.matmul %260, %261, %cst_52 {dimension_numbers = #tpu.dot_dimension_numbers<[1], [0], [0], [1], [0, 0, 1, 1], [], []>} : vector<8x128xbf16>, vector<128x128xbf16>, vector<8x128xf32> -> vector<8x128xf32>
      %c0_53 = arith.constant 0 : index
      %c0_54 = arith.constant 0 : index
      %263 = vector.load %arg5[%c0_53, %c0_54] : memref<1x128xf32, #tpu.memory_space<vmem>>, vector<1x128xf32>
      %264 = vector.broadcast %263 : vector<1x128xf32> to vector<8x128xf32>
      %265 = arith.addf %262, %264 : vector<8x128xf32>
      %c0_55 = arith.constant 0 : index
      %c0_56 = arith.constant 0 : index
      %266 = vector.load %arg6[%c0_55, %c0_56] : memref<8x128xf32, #tpu.memory_space<vmem>>, vector<8x128xf32>
      tpu.vector_store %arg6[%c0_55, %c0_56], %265 {strides = array<i32>} : memref<8x128xf32, #tpu.memory_space<vmem>>, vector<8x128xf32>,
    } else {
    }
    return
  }
  func.func @transform_0(%arg0: i32) -> (i32, i32, i32) {
    %c0_i32 = arith.constant 0 : i32
    %c0_i32_0 = arith.constant 0 : i32
    %c0_i32_1 = arith.constant 0 : i32
    return %arg0, %c0_i32, %c0_i32_0 : i32, i32, i32
  }
  func.func @transform_1(%arg0: i32) -> (i32, i32) {
    %c0_i32 = arith.constant 0 : i32
    %c0_i32_0 = arith.constant 0 : i32
    %c0_i32_1 = arith.constant 0 : i32
    return %c0_i32, %c0_i32_0 : i32, i32
  }
  func.func @transform_2(%arg0: i32) -> (i32, i32) {
    %c0_i32 = arith.constant 0 : i32
    %c0_i32_0 = arith.constant 0 : i32
    %c0_i32_1 = arith.constant 0 : i32
    return %c0_i32, %c0_i32_0 : i32, i32
  }
  func.func @transform_3(%arg0: i32) -> (i32, i32) {
    %c0_i32 = arith.constant 0 : i32
    %c0_i32_0 = arith.constant 0 : i32
    %c0_i32_1 = arith.constant 0 : i32
    return %c0_i32, %c0_i32_0 : i32, i32
  }
  func.func @transform_4(%arg0: i32) -> (i32, i32) {
    %c0_i32 = arith.constant 0 : i32
    %c0_i32_0 = arith.constant 0 : i32
    %c0_i32_1 = arith.constant 0 : i32
    return %c0_i32, %c0_i32_0 : i32, i32
  }
  func.func @transform_5(%arg0: i32) -> (i32, i32) {
    %c0_i32 = arith.constant 0 : i32
    %c0_i32_0 = arith.constant 0 : i32
    %c0_i32_1 = arith.constant 0 : i32
    return %c0_i32, %c0_i32_0 : i32, i32
  }
}

</mosaic_0001>

<bundles_post_ra>
// kernel: tpu_custom_call.1
= control target key start
LH: loop header
LB: loop body
LE: loop exit
PB: predicated region body
PF: predicated region fallthrough
CT: control target
= control target key end

     0   :  { %10 = vsyncpa [#allocation4], 0  ;;  %s1800_s0 = inlined_call_operand.hbm [shape: bf16[8,8,384], index: 0, kind: input, shape index: {}]   ;;  %s1801_s1 = inlined_call_operand.hbm [shape: bf16[128,384], index: 1, kind: input, shape index: {}]   ;;  %s1802_s2 = inlined_call_operand.vmem [shape: f32[1,128], index: 2, kind: input, shape index: {}]   ;;  %s1803_s3 = inlined_call_operand.hbm [shape: bf16[128,128], index: 3, kind: input, shape index: {}]   ;;  %s1804_s4 = inlined_call_operand.vmem [shape: f32[1,128], index: 4, kind: input, shape index: {}]   ;;  %s1805_s5 = inlined_call_operand.hbm [shape: f32[8,128], index: 5, kind: output, shape index: {}]  }
   0x1   :  { %11 = vsyncpa [#allocation7], 0 }
   0x2   :  { %12 = vsyncpa [#allocation5], 0  ;;  %s30_s20 = sshll.u32 %s1801_s1, 4  ;;  %s1456_s21 = smov [#allocation6]   ;;  %s31_s20 = int_to_ptr.hbm [resolvable:$true] %s30_s20 }
   0x3   :  { %s32_s22 = sshll.u32 %s1456_s21, 4  ;;  %s17_s25 = sshll.u32 %s1800_s0, 4  ;;  %s33_s22 = int_to_ptr.vmem [resolvable:$true] %s32_s22  ;;  %s18_s25 = int_to_ptr.hbm [resolvable:$true] %s17_s25 }
   0x4   :  { %s1457_s26 = smov 192   ;;  %s1458_s27 = smov 12  }
   0x5   :  { %38 = dma.hbm_to_vmem [thread:$0]  %s31_s20, 3072, %s33_s22, [#allocation7], %s1457_s26, %s1457_s26, %s1458_s27  }
   0x6   :  { %s1459_s28 = smov [#allocation3]   ;;  %s45_s7 = sshll.u32 %s1803_s3, 4  ;;  %s46_s7 = int_to_ptr.hbm [resolvable:$true] %s45_s7 }
   0x7   :  { %s19_s29 = sshll.u32 %s1459_s28, 4  ;;  %s1460_s1 = smov [#allocation8]   ;;  %s20_s29 = int_to_ptr.vmem [resolvable:$true] %s19_s29 }
   0x8   :  { %25 = dma.hbm_to_vmem [thread:$0]  %s18_s25, 1536, %s20_s29, [#allocation4], %s1457_s26, %s1457_s26, %s1458_s27  }
   0x9   :  { %s47_s8 = sshll.u32 %s1460_s1, 4  ;;  %s1461_s9 = smov 64   ;;  %s48_s8 = int_to_ptr.vmem [resolvable:$true] %s47_s8 }
   0xa   :  { %s1462_s10 = smov 4  }
   0xb   :  { %53 = dma.hbm_to_vmem [thread:$0]  %s46_s7, 1024, %s48_s8, [#allocation7], %s1461_s9, %s1461_s9, %s1462_s10  }
   0xc   :  { %1450 = dma.done.wait [#allocation4], 1536  }
   0xd   :  { %1451 = vsyncadd [#allocation4], 4294965760 }
   0xe   :  { %1452 = dma.done.wait [#allocation7], 4096  }
   0xf   :  { %1453 = vsyncadd [#allocation7], 4294963200  ;;  %v1172_v0 = vld [vmem:[#allocation6 + $0xa8] sm:$0xf]  ;;  %v1252_v1 = vld [vmem:[#allocation6 + $0xb0] sm:$0xf0] }
  0x10   :  { %v1251_v2 = vld [vmem:[#allocation6 + $0xac] sm:$0xf]  ;;  %v1504_v3 = vor.u32 %v1252_v1, %v1172_v0  ;;  %v1174_v4 = vld [vmem:[#allocation6 + $0xb4] sm:$0xf0]  ;;  %v1160_v5 = vld [vmem:[#allocation6 + $0x90] sm:$0xf] }
  0x11   :  { %v1249_v6 = vld [vmem:[#allocation6 + $0x98] sm:$0xf0]  ;;  %v1506_v7 = vor.u32 %v1251_v2, %v1174_v4  ;;  %v1248_v8 = vld [vmem:[#allocation6 + $0x94] sm:$0xf]  ;;  %v1162_v9 = vld [vmem:[#allocation6 + $0x9c] sm:$0xf0] }
  0x12   :  { %244 = vmatpush.bf16.msra.mxu0 %v1504_v3  ;;  %v1509_v10 = vor.u32 %v1249_v6, %v1160_v5  ;;  %337 = vmatpush.bf16.msra.mxu3 %v1504_v3  ;;  %v1513_v11 = vor.u32 %v1248_v8, %v1162_v9  ;;  %v1148_v12 = vld [vmem:[#allocation6 + $0x78] sm:$0xf]  ;;  %v1246_v13 = vld [vmem:[#allocation6 + $0x80] sm:$0xf0]  ;;  %v1245_v14 = vld [vmem:[#allocation6 + $0x7c] sm:$0xf] }
  0x13   :  { %257 = vmatpush.bf16.msra.mxu1 %v1506_v7  ;;  %v1150_v15 = vld [vmem:[#allocation6 + $0x84] sm:$0xf0]  ;;  %v1180_v16 = vld [vmem:[#allocation6 + $0xb0] sm:$0xf]  ;;  %v1253_v17 = vld [vmem:[#allocation6 + $0xb8] sm:$0xf0]  ;;  %v1518_v19 = vor.u32 %v1246_v13, %v1148_v12 }
  0x14   :  { %v1515_v18 = vor.u32 %v1253_v17, %v1180_v16  ;;  %v1168_v20 = vld [vmem:[#allocation6 + $0x98] sm:$0xf]  ;;  %v1250_v21 = vld [vmem:[#allocation6 + $0xa0] sm:$0xf0]  ;;  %v1522_v22 = vor.u32 %v1245_v14, %v1150_v15  ;;  %v1136_v23 = vld [vmem:[#allocation6 + $0x60] sm:$0xf] }
  0x15   :  { %v1243_v24 = vld [vmem:[#allocation6 + $0x68] sm:$0xf0]  ;;  %v1242_v25 = vld [vmem:[#allocation6 + $0x64] sm:$0xf]  ;;  %v1525_v26 = vor.u32 %v1250_v21, %v1168_v20  ;;  %v1138_v27 = vld [vmem:[#allocation6 + $0x6c] sm:$0xf0] }
  0x16   :  { %245 = vmatpush.bf16.msra.mxu0 %v1509_v10  ;;  %338 = vmatpush.bf16.msra.mxu3 %v1509_v10  ;;  %v1156_v28 = vld [vmem:[#allocation6 + $0x80] sm:$0xf]  ;;  %v1247_v29 = vld [vmem:[#allocation6 + $0x88] sm:$0xf0]  ;;  %v1528_v30 = vor.u32 %v1243_v24, %v1136_v23  ;;  %v1532_v31 = vor.u32 %v1242_v25, %v1138_v27  ;;  %v1124_v32 = vld [vmem:[#allocation6 + $0x48] sm:$0xf] }
  0x17   :  { %258 = vmatpush.bf16.msra.mxu1 %v1513_v11  ;;  %270 = vmatpush.bf16.msra.mxu2 %v1515_v18  ;;  %v1240_v33 = vld [vmem:[#allocation6 + $0x50] sm:$0xf0]  ;;  %v1239_v34 = vld [vmem:[#allocation6 + $0x4c] sm:$0xf]  ;;  %v1535_v35 = vor.u32 %v1247_v29, %v1156_v28  ;;  %v1126_v36 = vld [vmem:[#allocation6 + $0x54] sm:$0xf0] }
  0x18   :  { %v1144_v37 = vld [vmem:[#allocation6 + $0x68] sm:$0xf]  ;;  %v1244_v38 = vld [vmem:[#allocation6 + $0x70] sm:$0xf0]  ;;  %v1538_v39 = vor.u32 %v1240_v33, %v1124_v32  ;;  %v1112_v40 = vld [vmem:[#allocation6 + $0x30] sm:$0xf]  ;;  %v1542_v42 = vor.u32 %v1239_v34, %v1126_v36 }
  0x19   :  { %v1237_v41 = vld [vmem:[#allocation6 + $0x38] sm:$0xf0]  ;;  %v1236_v43 = vld [vmem:[#allocation6 + $0x34] sm:$0xf]  ;;  %v1545_v44 = vor.u32 %v1244_v38, %v1144_v37  ;;  %v1114_v45 = vld [vmem:[#allocation6 + $0x3c] sm:$0xf0] }
  0x1a   :  { %246 = vmatpush.bf16.msra.mxu0 %v1518_v19  ;;  %339 = vmatpush.bf16.msra.mxu3 %v1518_v19  ;;  %v1132_v46 = vld [vmem:[#allocation6 + $0x50] sm:$0xf]  ;;  %v1241_v47 = vld [vmem:[#allocation6 + $0x58] sm:$0xf0]  ;;  %v1548_v48 = vor.u32 %v1237_v41, %v1112_v40  ;;  %v1552_v49 = vor.u32 %v1236_v43, %v1114_v45  ;;  %v1100_v50 = vld [vmem:[#allocation6 + $0x18] sm:$0xf] }
  0x1b   :  { %259 = vmatpush.bf16.msra.mxu1 %v1522_v22  ;;  %271 = vmatpush.bf16.msra.mxu2 %v1525_v26  ;;  %v1234_v51 = vld [vmem:[#allocation6 + $0x20] sm:$0xf0]  ;;  %v1233_v52 = vld [vmem:[#allocation6 + $0x1c] sm:$0xf]  ;;  %v1555_v53 = vor.u32 %v1241_v47, %v1132_v46  ;;  %v1102_v54 = vld [vmem:[#allocation6 + $0x24] sm:$0xf0] }
  0x1c   :  { %v1120_v55 = vld [vmem:[#allocation6 + $0x38] sm:$0xf]  ;;  %v1238_v56 = vld [vmem:[#allocation6 + $0x40] sm:$0xf0]  ;;  %v1558_v57 = vor.u32 %v1234_v51, %v1100_v50  ;;  %v1562_v58 = vor.u32 %v1233_v52, %v1102_v54  ;;  %v1088_v59 = vld [vmem:[#allocation6] sm:$0xf] }
  0x1d   :  { %v1231_v60 = vld [vmem:[#allocation6 + $0x8] sm:$0xf0]  ;;  %v1230_v61 = vld [vmem:[#allocation6 + $0x4] sm:$0xf]  ;;  %v1565_v62 = vor.u32 %v1238_v56, %v1120_v55  ;;  %v1090_v63 = vld [vmem:[#allocation6 + $0xc] sm:$0xf0] }
  0x1e   :  { %247 = vmatpush.bf16.msra.mxu0 %v1528_v30  ;;  %340 = vmatpush.bf16.msra.mxu3 %v1528_v30  ;;  %v1108_v0 = vld [vmem:[#allocation6 + $0x20] sm:$0xf]  ;;  %v1235_v1 = vld [vmem:[#allocation6 + $0x28] sm:$0xf0]  ;;  %v1568_v2 = vor.u32 %v1231_v60, %v1088_v59  ;;  %v1572_v4 = vor.u32 %v1230_v61, %v1090_v63  ;;  %v1096_v6 = vld [vmem:[#allocation6 + $0x8] sm:$0xf] }
  0x1f   :  { %260 = vmatpush.bf16.msra.mxu1 %v1532_v31  ;;  %272 = vmatpush.bf16.msra.mxu2 %v1535_v35  ;;  %v1575_v5 = vor.u32 %v1235_v1, %v1108_v0  ;;  %v1232_v8 = vld [vmem:[#allocation6 + $0x10] sm:$0xf0]  ;;  %v1463_v12 = vmov 0.0|0.0   ;;  %v110_v13 = vld [vmem:[#allocation3] sm:$0xff]  ;;  %v111_v51 = vld [vmem:[#allocation3 + $0x8] sm:$0xf] }
  0x20   :  { %v1581_v9 = vor.u32 %v1232_v8, %v1096_v6  ;;  %v112_v14 = vunpack.c.l.bf16 %v110_v13  ;;  %v113_v15 = vunpack.c.h.bf16 %v110_v13  ;;  %v1643_v41 = vld [vmem:[%s1802_s2] ss:$0 sm:$0xff]  ;;  %v114_v59 = vunpack.c.l.bf16 %v111_v51  ;;  %s1464_s14 = smov [#allocation9]   ;;  %s1075_s18 = sshll.u32 %s1805_s5, 4  ;;  %s1076_s18 = int_to_ptr.hbm [resolvable:$true] %s1075_s18 }
  0x21   :  { %s1073_s15 = sshll.u32 %s1464_s14, 4  ;;  %s1074_s15 = int_to_ptr.vmem [resolvable:$true] %s1073_s15 }
  0x22   :  { %248 = vmatpush.bf16.msra.mxu0 %v1538_v39  ;;  %341 = vmatpush.bf16.msra.mxu3 %v1538_v39 }
  0x23   :  { %261 = vmatpush.bf16.msra.mxu1 %v1542_v42  ;;  %273 = vmatpush.bf16.msra.mxu2 %v1545_v44 }
  0x26   :  { %249 = vmatpush.bf16.msra.mxu0 %v1548_v48  ;;  %342 = vmatpush.bf16.msra.mxu3 %v1548_v48 }
  0x27   :  { %262 = vmatpush.bf16.msra.mxu1 %v1552_v49  ;;  %274 = vmatpush.bf16.msra.mxu2 %v1555_v53 }
  0x2a   :  { %250 = vmatpush.bf16.msra.mxu0 %v1558_v57  ;;  %343 = vmatpush.bf16.msra.mxu3 %v1558_v57 }
  0x2b   :  { %263 = vmatpush.bf16.msra.mxu1 %v1562_v58  ;;  %275 = vmatpush.bf16.msra.mxu2 %v1565_v62 }
  0x2e   :  { %251 = vmatpush.bf16.msra.mxu0 %v1568_v2  ;;  %344 = vmatpush.bf16.msra.mxu3 %v1568_v2 }
  0x2f   :  { %264 = vmatpush.bf16.msra.mxu1 %v1572_v4  ;;  %276 = vmatpush.bf16.msra.mxu2 %v1575_v5 }
  0x31   :  { %252 = vmatmul.bf16.vlgmr.msra.gmra.mxu0 %v1463_v12 }
  0x32   :  { %350 = vmatpush.bf16.msrb.mxu0 %v1506_v7  ;;  %443 = vmatpush.bf16.msrb.mxu3 %v1506_v7 }
  0x33   :  { %363 = vmatpush.bf16.msrb.mxu1 %v1515_v18  ;;  %277 = vmatpush.bf16.msra.mxu2 %v1581_v9 }
  0x34   :  { %265 = vmatmul.bf16.vlgmr.msra.gmra.mxu1 %v1463_v12 }
  0x36   :  { %351 = vmatpush.bf16.msrb.mxu0 %v1513_v11  ;;  %444 = vmatpush.bf16.msrb.mxu3 %v1513_v11 }
  0x37   :  { %364 = vmatpush.bf16.msrb.mxu1 %v1525_v26  ;;  %430 = vmatpush.bf16.msrb.mxu2 %v1504_v3 }
  0x38   :  { %278 = vmatmul.bf16.vlgmr.msra.gmra.mxu2 %v1463_v12 }
  0x3a   :  { %352 = vmatpush.bf16.msrb.mxu0 %v1522_v22  ;;  %445 = vmatpush.bf16.msrb.mxu3 %v1522_v22 }
  0x3b   :  { %365 = vmatpush.bf16.msrb.mxu1 %v1535_v35  ;;  %431 = vmatpush.bf16.msrb.mxu2 %v1509_v10 }
  0x3e   :  { %353 = vmatpush.bf16.msrb.mxu0 %v1532_v31  ;;  %446 = vmatpush.bf16.msrb.mxu3 %v1532_v31 }
  0x3f   :  { %366 = vmatpush.bf16.msrb.mxu1 %v1545_v44  ;;  %432 = vmatpush.bf16.msrb.mxu2 %v1518_v19 }
  0x42   :  { %354 = vmatpush.bf16.msrb.mxu0 %v1542_v42  ;;  %447 = vmatpush.bf16.msrb.mxu3 %v1542_v42 }
  0x43   :  { %367 = vmatpush.bf16.msrb.mxu1 %v1555_v53  ;;  %433 = vmatpush.bf16.msrb.mxu2 %v1528_v30 }
  0x46   :  { %355 = vmatpush.bf16.msrb.mxu0 %v1552_v49  ;;  %448 = vmatpush.bf16.msrb.mxu3 %v1552_v49 }
  0x47   :  { %368 = vmatpush.bf16.msrb.mxu1 %v1565_v62  ;;  %434 = vmatpush.bf16.msrb.mxu2 %v1538_v39 }
  0x4a   :  { %356 = vmatpush.bf16.msrb.mxu0 %v1562_v58  ;;  %449 = vmatpush.bf16.msrb.mxu3 %v1562_v58 }
  0x4b   :  { %369 = vmatpush.bf16.msrb.mxu1 %v1575_v5  ;;  %435 = vmatpush.bf16.msrb.mxu2 %v1548_v48 }
  0x4e   :  { %357 = vmatpush.bf16.msrb.mxu0 %v1572_v4  ;;  %450 = vmatpush.bf16.msrb.mxu3 %v1572_v4 }
  0x4f   :  { %370 = vmatpush.bf16.msrb.mxu1 %v1581_v9  ;;  %436 = vmatpush.bf16.msrb.mxu2 %v1558_v57 }
  0x52   :  { %456 = vmatpush.bf16.msra.mxu0 %v1515_v18 }
  0x53   :  { %523 = vmatpush.bf16.msra.mxu1 %v1504_v3  ;;  %437 = vmatpush.bf16.msrb.mxu2 %v1568_v2 }
  0x56   :  { %457 = vmatpush.bf16.msra.mxu0 %v1525_v26 }
  0x57   :  { %536 = vmatpush.bf16.msra.mxu2 %v1506_v7  ;;  %524 = vmatpush.bf16.msra.mxu1 %v1509_v10 }
  0x5a   :  { %458 = vmatpush.bf16.msra.mxu0 %v1535_v35 }
  0x5b   :  { %537 = vmatpush.bf16.msra.mxu2 %v1513_v11  ;;  %525 = vmatpush.bf16.msra.mxu1 %v1518_v19 }
  0x5e   :  { %459 = vmatpush.bf16.msra.mxu0 %v1545_v44 }
  0x5f   :  { %538 = vmatpush.bf16.msra.mxu2 %v1522_v22  ;;  %526 = vmatpush.bf16.msra.mxu1 %v1528_v30 }
  0x62   :  { %460 = vmatpush.bf16.msra.mxu0 %v1555_v53 }
  0x63   :  { %539 = vmatpush.bf16.msra.mxu2 %v1532_v31  ;;  %527 = vmatpush.bf16.msra.mxu1 %v1538_v39 }
  0x66   :  { %461 = vmatpush.bf16.msra.mxu0 %v1565_v62 }
  0x67   :  { %540 = vmatpush.bf16.msra.mxu2 %v1542_v42  ;;  %528 = vmatpush.bf16.msra.mxu1 %v1548_v48 }
  0x6a   :  { %462 = vmatpush.bf16.msra.mxu0 %v1575_v5 }
  0x6b   :  { %541 = vmatpush.bf16.msra.mxu2 %v1552_v49  ;;  %529 = vmatpush.bf16.msra.mxu1 %v1558_v57 }
  0x6e   :  { %463 = vmatpush.bf16.msra.mxu0 %v1581_v9 }
  0x6f   :  { %542 = vmatpush.bf16.msra.mxu2 %v1562_v58  ;;  %530 = vmatpush.bf16.msra.mxu1 %v1568_v2 }
  0x73   :  { %543 = vmatpush.bf16.msra.mxu2 %v1572_v4 }
  0xae   :  { %v253_v16 = vpop.f32.mrf.mxu0 }
  0xaf   :  { %v283_v17 = vadd.f32 %v253_v16, %v112_v14 }
  0xb1   :  { %v266_v20 = vpop.f32.mrf.mxu1  ;;  %v1182_v23 = vmul.f32 -1.442695, %v283_v17 }
  0xb2   :  { %v303_v21 = vadd.f32 %v266_v20, %v113_v15 }
  0xb3   :  { %1273 = vpow2.f32 %v1182_v23 }
  0xb4   :  { %v1183_v24 = vmul.f32 -1.442695, %v303_v21 }
  0xb6   :  { %1275 = vpow2.f32 %v1183_v24  ;;  %v255_v25 = vpop.f32.mrf.mxu0  ;;  %v331_v24 = vld [vmem:[#allocation3 + $0xc] sm:$0xff] }
  0xb7   :  { %v334_v25 = vunpack.c.h.bf16 %v331_v24 }
  0xb9   :  { %v268_v27 = vpop.f32.mrf.mxu1  ;;  %v1274_v28 = vpop.eup %1273 }
  0xba   :  { %v287_v33 = vadd.f32 1.0, %v1274_v28 }
  0xbb   :  { %v279_v29 = vpop.f32.mrf.mxu2 }
  0xbc   :  { %v1276_v32 = vpop.eup %1275  ;;  %1277 = vrcp.f32 %v287_v33  ;;  %v299_v46 = vand.u32 2147483648, %v287_v33  ;;  %v297_v50 = vand.u32 2147483647, %v287_v33  ;;  %vm293_vm1 = vweird.f32 %v287_v33 }
  0xbd   :  { %v307_v34 = vadd.f32 1.0, %v1276_v32  ;;  %v323_v54 = vadd.f32 %v1643_v41, %v279_v29  ;;  %v333_v32 = vunpack.c.l.bf16 %v331_v24 }
  0xbe   :  { %v300_v56 = vor.u32 1.1754944e-38, %v299_v46  ;;  %vm298_vm3 = vcmp.eq.f32.partialorder %v297_v50, 8.507059e+37 }
  0xbf   :  { %1279 = vrcp.f32 %v307_v34  ;;  %vm313_vm4 = vweird.f32 %v307_v34  ;;  %v319_v6 = vand.u32 2147483648, %v307_v34  ;;  %v317_v12 = vand.u32 2147483647, %v307_v34 }
  0xc1   :  { %v320_v13 = vor.u32 1.1754944e-38, %v319_v6  ;;  %vm318_vm7 = vcmp.eq.f32.partialorder %v317_v12, 8.507059e+37 }
  0xc2   :  { %v1278_v37 = vpop.eup %1277 }
  0xc3   :  { %v281_v36 = vpop.f32.mrf.mxu2  ;;  %v289_v40 = vmul.f32 %v1278_v37, %v287_v33  ;;  %vm294_vm0 = vweird.f32 %v1278_v37 }
  0xc4   :  { %vm295_vm2 = vmor %vm293_vm1, %vm294_vm0 }
  0xc5   :  { %v1280_v38 = vpop.eup %1279  ;;  %v290_v43 = vsub.f32 1.0, %v289_v40 }
  0xc6   :  { %v309_v45 = vmul.f32 %v1280_v38, %v307_v34  ;;  %vm314_vm5 = vweird.f32 %v1280_v38 }
  0xc7   :  { %v291_v47 = vmul.f32 %v1278_v37, %v290_v43  ;;  %vm315_vm6 = vmor %vm313_vm4, %vm314_vm5 }
  0xc8   :  { %v310_v55 = vsub.f32 1.0, %v309_v45 }
  0xc9   :  { %v292_v52 = vadd.f32 %v1278_v37, %v291_v47 }
  0xca   :  { %v311_v0 = vmul.f32 %v1280_v38, %v310_v55 }
  0xcb   :  { %v296_v60 = vsel %vm295_vm2, %v1278_v37, %v292_v52 }
  0xcc   :  { %v301_v61 = vsel %vm298_vm3, %v300_v56, %v296_v60  ;;  %v312_v8 = vadd.f32 %v1280_v38, %v311_v0 }
  0xcd   :  { %v324_v63 = vmul.f32 %v323_v54, %v301_v61 }
  0xce   :  { %v316_v14 = vsel %vm315_vm6, %v1280_v38, %v312_v8 }
  0xcf   :  { %v325_v1 = vadd.f32 %v324_v63, %v114_v59  ;;  %v321_v17 = vsel %vm318_vm7, %v320_v13, %v316_v14  ;;  %v332_v63 = vld [vmem:[#allocation3 + $0x14] sm:$0xf] }
  0xd0   :  { %v335_v12 = vunpack.c.l.bf16 %v332_v63 }
  0xd1   :  { %1281 = vtanh.f32 %v325_v1 }
  0xd7   :  { %v1282_v15 = vpop.eup %1281 }
  0xd8   :  { %v327_v16 = vsub.f32 0.0, %v1282_v15 }
  0xda   :  { %v328_v20 = vmul.f32 %v327_v16, %v321_v17 }
  0xdc   :  { %v1646_v21 = vadd.f32 %v1282_v15, %v328_v20 }
  0xde   :  { %v336_v23 = vpack.c.bf16 %v1646_v21, %v1646_v21 }
  0xe0   :  { %345 = vmatmul.bf16.vlgmr.msra.gmra.mxu3 %v336_v23  ;;  %358 = vmatmul.bf16.vlgmr.msrb.gmra.mxu0 %v336_v23 }
  0xe1   :  { %371 = vmatmul.bf16.vlgmr.msrb.gmra.mxu1 %v336_v23  ;;  %549 = vmatpush.bf16.msra.mxu3 %v1515_v18 }
  0xe2   :  { %616 = vmatpush.bf16.msrb.mxu0 %v1504_v3  ;;  %629 = vmatpush.bf16.msrb.mxu1 %v1506_v7 }
  0xe5   :  { %550 = vmatpush.bf16.msra.mxu3 %v1525_v26 }
  0xe6   :  { %617 = vmatpush.bf16.msrb.mxu0 %v1509_v10  ;;  %630 = vmatpush.bf16.msrb.mxu1 %v1513_v11 }
  0xe9   :  { %551 = vmatpush.bf16.msra.mxu3 %v1535_v35 }
  0xea   :  { %618 = vmatpush.bf16.msrb.mxu0 %v1518_v19  ;;  %631 = vmatpush.bf16.msrb.mxu1 %v1522_v22 }
  0xed   :  { %552 = vmatpush.bf16.msra.mxu3 %v1545_v44 }
  0xee   :  { %619 = vmatpush.bf16.msrb.mxu0 %v1528_v30  ;;  %632 = vmatpush.bf16.msrb.mxu1 %v1532_v31 }
  0xf1   :  { %553 = vmatpush.bf16.msra.mxu3 %v1555_v53 }
  0xf2   :  { %620 = vmatpush.bf16.msrb.mxu0 %v1538_v39  ;;  %633 = vmatpush.bf16.msrb.mxu1 %v1542_v42 }
  0xf5   :  { %554 = vmatpush.bf16.msra.mxu3 %v1565_v62 }
  0xf6   :  { %621 = vmatpush.bf16.msrb.mxu0 %v1548_v48  ;;  %634 = vmatpush.bf16.msrb.mxu1 %v1552_v49 }
  0xf9   :  { %555 = vmatpush.bf16.msra.mxu3 %v1575_v5 }
  0xfa   :  { %622 = vmatpush.bf16.msrb.mxu0 %v1558_v57  ;;  %635 = vmatpush.bf16.msrb.mxu1 %v1562_v58 }
  0xfd   :  { %556 = vmatpush.bf16.msra.mxu3 %v1581_v9 }
  0xfe   :  { %623 = vmatpush.bf16.msrb.mxu0 %v1568_v2  ;;  %636 = vmatpush.bf16.msrb.mxu1 %v1572_v4 }
 0x15d   :  { %v359_v27 = vpop.f32.mrf.mxu0 }
 0x15e   :  { %v396_v28 = vadd.f32 %v359_v27, %v334_v25  ;;  %v372_v29 = vpop.f32.mrf.mxu1 }
 0x15f   :  { %v416_v8 = vadd.f32 %v1643_v41, %v372_v29 }
 0x160   :  { %v1185_v33 = vmul.f32 -1.442695, %v396_v28 }
 0x162   :  { %1283 = vpow2.f32 %v1185_v33 }
 0x163   :  { %v346_v34 = vpop.f32.mrf.mxu3 }
 0x164   :  { %v376_v36 = vadd.f32 %v346_v34, %v333_v32 }
 0x165   :  { %v361_v37 = vpop.f32.mrf.mxu0 }
 0x166   :  { %v1184_v38 = vmul.f32 -1.442695, %v376_v36  ;;  %v374_v40 = vpop.f32.mrf.mxu1 }
 0x168   :  { %1285 = vpow2.f32 %v1184_v38  ;;  %v1284_v43 = vpop.eup %1283 }
 0x169   :  { %v400_v47 = vadd.f32 1.0, %v1284_v43 }
 0x16b   :  { %v348_v45 = vpop.f32.mrf.mxu3  ;;  %v412_v23 = vand.u32 2147483648, %v400_v47  ;;  %vm406_vm13 = vweird.f32 %v400_v47  ;;  %v410_v24 = vand.u32 2147483647, %v400_v47 }
 0x16d   :  { %v413_v28 = vor.u32 1.1754944e-38, %v412_v23  ;;  %vm411_vm15 = vcmp.eq.f32.partialorder %v410_v24, 8.507059e+37 }
 0x16e   :  { %v1286_v46 = vpop.eup %1285 }
 0x16f   :  { %v380_v50 = vadd.f32 1.0, %v1286_v46 }
 0x171   :  { %1287 = vrcp.f32 %v380_v50  ;;  %v392_v59 = vand.u32 2147483648, %v380_v50  ;;  %v390_v61 = vand.u32 2147483647, %v380_v50  ;;  %vm386_vm9 = vweird.f32 %v380_v50 }
 0x172   :  { %1289 = vrcp.f32 %v400_v47 }
 0x173   :  { %v393_v6 = vor.u32 1.1754944e-38, %v392_v59  ;;  %vm391_vm11 = vcmp.eq.f32.partialorder %v390_v61, 8.507059e+37 }
 0x177   :  { %v1288_v51 = vpop.eup %1287 }
 0x178   :  { %v1290_v52 = vpop.eup %1289  ;;  %v382_v54 = vmul.f32 %v1288_v51, %v380_v50  ;;  %vm387_vm8 = vweird.f32 %v1288_v51 }
 0x179   :  { %v402_v56 = vmul.f32 %v1290_v52, %v400_v47  ;;  %vm388_vm10 = vmor %vm386_vm9, %vm387_vm8  ;;  %vm407_vm12 = vweird.f32 %v1290_v52 }
 0x17a   :  { %v383_v55 = vsub.f32 1.0, %v382_v54  ;;  %vm408_vm14 = vmor %vm406_vm13, %vm407_vm12 }
 0x17b   :  { %v403_v1 = vsub.f32 1.0, %v402_v56 }
 0x17c   :  { %v384_v60 = vmul.f32 %v1288_v51, %v383_v55 }
 0x17d   :  { %v404_v16 = vmul.f32 %v1290_v52, %v403_v1 }
 0x17e   :  { %v385_v0 = vadd.f32 %v1288_v51, %v384_v60 }
 0x17f   :  { %v405_v20 = vadd.f32 %v1290_v52, %v404_v16 }
 0x180   :  { %v389_v13 = vsel %vm388_vm10, %v1288_v51, %v385_v0 }
 0x181   :  { %v394_v14 = vsel %vm391_vm11, %v393_v6, %v389_v13  ;;  %v409_v25 = vsel %vm408_vm14, %v1290_v52, %v405_v20 }
 0x182   :  { %v417_v15 = vmul.f32 %v416_v8, %v394_v14  ;;  %v414_v32 = vsel %vm411_vm15, %v413_v28, %v409_v25 }
 0x184   :  { %v418_v17 = vadd.f32 %v417_v15, %v335_v12  ;;  %v425_v15 = vld [vmem:[#allocation3 + $0x20] sm:$0xf] }
 0x185   :  { %v428_v25 = vunpack.c.l.bf16 %v425_v15 }
 0x186   :  { %1291 = vtanh.f32 %v418_v17 }
 0x18c   :  { %v1292_v27 = vpop.eup %1291 }
 0x18d   :  { %v420_v29 = vsub.f32 %v1646_v21, %v1292_v27  ;;  %v424_v21 = vld [vmem:[#allocation3 + $0x18] sm:$0xff] }
 0x18e   :  { %v426_v38 = vunpack.c.l.bf16 %v424_v21  ;;  %v427_v40 = vunpack.c.h.bf16 %v424_v21 }
 0x18f   :  { %v421_v33 = vmul.f32 %v420_v29, %v414_v32 }
 0x191   :  { %v1676_v34 = vadd.f32 %v1292_v27, %v421_v33 }
 0x193   :  { %v429_v36 = vpack.c.bf16 %v1676_v34, %v1676_v34 }
 0x195   :  { %438 = vmatmul.bf16.vlgmr.msrb.gmra.mxu2 %v429_v36  ;;  %451 = vmatmul.bf16.vlgmr.msrb.gmra.mxu3 %v429_v36 }
 0x196   :  { %464 = vmatmul.bf16.vlgmr.msra.gmra.mxu0 %v429_v36  ;;  %642 = vmatpush.bf16.msrb.mxu2 %v1515_v18 }
 0x197   :  { %709 = vmatpush.bf16.msrb.mxu3 %v1504_v3  ;;  %722 = vmatpush.bf16.msra.mxu0 %v1506_v7 }
 0x19a   :  { %643 = vmatpush.bf16.msrb.mxu2 %v1525_v26 }
 0x19b   :  { %710 = vmatpush.bf16.msrb.mxu3 %v1509_v10  ;;  %723 = vmatpush.bf16.msra.mxu0 %v1513_v11 }
 0x19e   :  { %644 = vmatpush.bf16.msrb.mxu2 %v1535_v35 }
 0x19f   :  { %711 = vmatpush.bf16.msrb.mxu3 %v1518_v19  ;;  %724 = vmatpush.bf16.msra.mxu0 %v1522_v22 }
 0x1a2   :  { %645 = vmatpush.bf16.msrb.mxu2 %v1545_v44 }
 0x1a3   :  { %712 = vmatpush.bf16.msrb.mxu3 %v1528_v30  ;;  %725 = vmatpush.bf16.msra.mxu0 %v1532_v31 }
 0x1a6   :  { %646 = vmatpush.bf16.msrb.mxu2 %v1555_v53 }
 0x1a7   :  { %713 = vmatpush.bf16.msrb.mxu3 %v1538_v39  ;;  %726 = vmatpush.bf16.msra.mxu0 %v1542_v42 }
 0x1aa   :  { %647 = vmatpush.bf16.msrb.mxu2 %v1565_v62 }
 0x1ab   :  { %714 = vmatpush.bf16.msrb.mxu3 %v1548_v48  ;;  %727 = vmatpush.bf16.msra.mxu0 %v1552_v49 }
 0x1ae   :  { %648 = vmatpush.bf16.msrb.mxu2 %v1575_v5 }
 0x1af   :  { %715 = vmatpush.bf16.msrb.mxu3 %v1558_v57  ;;  %728 = vmatpush.bf16.msra.mxu0 %v1562_v58 }
 0x1b2   :  { %649 = vmatpush.bf16.msrb.mxu2 %v1581_v9 }
 0x1b3   :  { %716 = vmatpush.bf16.msrb.mxu3 %v1568_v2  ;;  %729 = vmatpush.bf16.msra.mxu0 %v1572_v4 }
 0x213   :  { %v465_v37 = vpop.f32.mrf.mxu0 }
 0x214   :  { %v509_v23 = vadd.f32 %v1643_v41, %v465_v37 }
 0x218   :  { %v439_v43 = vpop.f32.mrf.mxu2  ;;  %v452_v45 = vpop.f32.mrf.mxu3 }
 0x219   :  { %v469_v46 = vadd.f32 %v439_v43, %v426_v38  ;;  %v489_v47 = vadd.f32 %v452_v45, %v427_v40 }
 0x21b   :  { %v1186_v50 = vmul.f32 -1.442695, %v469_v46  ;;  %v1187_v51 = vmul.f32 -1.442695, %v489_v47  ;;  %v467_v52 = vpop.f32.mrf.mxu0 }
 0x21d   :  { %1293 = vpow2.f32 %v1186_v50 }
 0x21e   :  { %1295 = vpow2.f32 %v1187_v51 }
 0x220   :  { %v441_v54 = vpop.f32.mrf.mxu2  ;;  %v454_v55 = vpop.f32.mrf.mxu3 }
 0x223   :  { %v1294_v56 = vpop.eup %1293 }
 0x224   :  { %v1296_v59 = vpop.eup %1295  ;;  %v473_v60 = vadd.f32 1.0, %v1294_v56 }
 0x225   :  { %v493_v61 = vadd.f32 1.0, %v1296_v59 }
 0x226   :  { %1297 = vrcp.f32 %v473_v60  ;;  %v485_v8 = vand.u32 2147483648, %v473_v60  ;;  %v483_v14 = vand.u32 2147483647, %v473_v60  ;;  %vm479_vm1 = vweird.f32 %v473_v60 }
 0x227   :  { %1299 = vrcp.f32 %v493_v61  ;;  %v505_v36 = vand.u32 2147483648, %v493_v61  ;;  %vm499_vm5 = vweird.f32 %v493_v61  ;;  %v503_v21 = vand.u32 2147483647, %v493_v61 }
 0x228   :  { %v486_v17 = vor.u32 1.1754944e-38, %v485_v8  ;;  %vm484_vm3 = vcmp.eq.f32.partialorder %v483_v14, 8.507059e+37 }
 0x229   :  { %v506_v43 = vor.u32 1.1754944e-38, %v505_v36  ;;  %vm504_vm7 = vcmp.eq.f32.partialorder %v503_v21, 8.507059e+37 }
 0x22c   :  { %v1298_v63 = vpop.eup %1297 }
 0x22d   :  { %v1300_v0 = vpop.eup %1299  ;;  %v475_v1 = vmul.f32 %v1298_v63, %v473_v60  ;;  %vm480_vm0 = vweird.f32 %v1298_v63 }
 0x22e   :  { %v495_v12 = vmul.f32 %v1300_v0, %v493_v61  ;;  %vm481_vm2 = vmor %vm479_vm1, %vm480_vm0  ;;  %vm500_vm4 = vweird.f32 %v1300_v0 }
 0x22f   :  { %v476_v6 = vsub.f32 1.0, %v475_v1  ;;  %vm501_vm6 = vmor %vm499_vm5, %vm500_vm4 }
 0x230   :  { %v496_v20 = vsub.f32 1.0, %v495_v12 }
 0x231   :  { %v477_v13 = vmul.f32 %v1298_v63, %v476_v6 }
 0x232   :  { %v497_v29 = vmul.f32 %v1300_v0, %v496_v20 }
 0x233   :  { %v478_v16 = vadd.f32 %v1298_v63, %v477_v13 }
 0x234   :  { %v498_v33 = vadd.f32 %v1300_v0, %v497_v29 }
 0x235   :  { %v482_v24 = vsel %vm481_vm2, %v1298_v63, %v478_v16 }
 0x236   :  { %v487_v27 = vsel %vm484_vm3, %v486_v17, %v482_v24  ;;  %v502_v38 = vsel %vm501_vm6, %v1300_v0, %v498_v33 }
 0x237   :  { %v510_v28 = vmul.f32 %v509_v23, %v487_v27  ;;  %v507_v45 = vsel %vm504_vm7, %v506_v43, %v502_v38  ;;  %v518_v23 = vld [vmem:[#allocation3 + $0x2c] sm:$0xf] }
 0x239   :  { %v511_v32 = vadd.f32 %v510_v28, %v428_v25 }
 0x23b   :  { %1301 = vtanh.f32 %v511_v32  ;;  %v521_v32 = vunpack.c.l.bf16 %v518_v23 }
 0x241   :  { %v1302_v40 = vpop.eup %1301 }
 0x242   :  { %v513_v37 = vsub.f32 %v1676_v34, %v1302_v40  ;;  %v517_v34 = vld [vmem:[#allocation3 + $0x24] sm:$0xff] }
 0x243   :  { %v519_v51 = vunpack.c.l.bf16 %v517_v34  ;;  %v520_v56 = vunpack.c.h.bf16 %v517_v34 }
 0x244   :  { %v514_v46 = vmul.f32 %v513_v37, %v507_v45 }
 0x246   :  { %v1706_v47 = vadd.f32 %v1302_v40, %v514_v46 }
 0x248   :  { %v522_v50 = vpack.c.bf16 %v1706_v47, %v1706_v47 }
 0x24a   :  { %531 = vmatmul.bf16.vlgmr.msra.gmra.mxu1 %v522_v50  ;;  %544 = vmatmul.bf16.vlgmr.msra.gmra.mxu2 %v522_v50 }
 0x24b   :  { %557 = vmatmul.bf16.vlgmr.msra.gmra.mxu3 %v522_v50  ;;  %735 = vmatpush.bf16.msra.mxu1 %v1515_v18 }
 0x24c   :  { %802 = vmatpush.bf16.msra.mxu2 %v1504_v3  ;;  %815 = vmatpush.bf16.msra.mxu3 %v1506_v7 }
 0x24f   :  { %736 = vmatpush.bf16.msra.mxu1 %v1525_v26 }
 0x250   :  { %803 = vmatpush.bf16.msra.mxu2 %v1509_v10  ;;  %816 = vmatpush.bf16.msra.mxu3 %v1513_v11 }
 0x253   :  { %737 = vmatpush.bf16.msra.mxu1 %v1535_v35 }
 0x254   :  { %804 = vmatpush.bf16.msra.mxu2 %v1518_v19  ;;  %817 = vmatpush.bf16.msra.mxu3 %v1522_v22 }
 0x257   :  { %738 = vmatpush.bf16.msra.mxu1 %v1545_v44 }
 0x258   :  { %805 = vmatpush.bf16.msra.mxu2 %v1528_v30  ;;  %818 = vmatpush.bf16.msra.mxu3 %v1532_v31 }
 0x25b   :  { %739 = vmatpush.bf16.msra.mxu1 %v1555_v53 }
 0x25c   :  { %806 = vmatpush.bf16.msra.mxu2 %v1538_v39  ;;  %819 = vmatpush.bf16.msra.mxu3 %v1542_v42 }
 0x25f   :  { %740 = vmatpush.bf16.msra.mxu1 %v1565_v62 }
 0x260   :  { %807 = vmatpush.bf16.msra.mxu2 %v1548_v48  ;;  %820 = vmatpush.bf16.msra.mxu3 %v1552_v49 }
 0x263   :  { %741 = vmatpush.bf16.msra.mxu1 %v1575_v5 }
 0x264   :  { %808 = vmatpush.bf16.msra.mxu2 %v1558_v57  ;;  %821 = vmatpush.bf16.msra.mxu3 %v1562_v58 }
 0x267   :  { %742 = vmatpush.bf16.msra.mxu1 %v1581_v9 }
 0x268   :  { %809 = vmatpush.bf16.msra.mxu2 %v1568_v2  ;;  %822 = vmatpush.bf16.msra.mxu3 %v1572_v4 }
 0x2c7   :  { %v532_v52 = vpop.f32.mrf.mxu1 }
 0x2c8   :  { %v562_v54 = vadd.f32 %v532_v52, %v519_v51 }
 0x2ca   :  { %v1188_v55 = vmul.f32 -1.442695, %v562_v54 }
 0x2cc   :  { %1303 = vpow2.f32 %v1188_v55 }
 0x2cd   :  { %v545_v59 = vpop.f32.mrf.mxu2 }
 0x2ce   :  { %v582_v60 = vadd.f32 %v545_v59, %v520_v56  ;;  %v558_v61 = vpop.f32.mrf.mxu3 }
 0x2cf   :  { %v534_v63 = vpop.f32.mrf.mxu1  ;;  %v602_v38 = vadd.f32 %v1643_v41, %v558_v61 }
 0x2d0   :  { %v1189_v0 = vmul.f32 -1.442695, %v582_v60 }
 0x2d2   :  { %v1304_v1 = vpop.eup %1303  ;;  %1305 = vpow2.f32 %v1189_v0 }
 0x2d3   :  { %v566_v6 = vadd.f32 1.0, %v1304_v1 }
 0x2d5   :  { %1307 = vrcp.f32 %v566_v6  ;;  %v547_v8 = vpop.f32.mrf.mxu2  ;;  %v578_v20 = vand.u32 2147483648, %v566_v6  ;;  %v576_v25 = vand.u32 2147483647, %v566_v6  ;;  %vm572_vm9 = vweird.f32 %v566_v6 }
 0x2d6   :  { %v560_v12 = vpop.f32.mrf.mxu3 }
 0x2d7   :  { %v579_v33 = vor.u32 1.1754944e-38, %v578_v20  ;;  %vm577_vm11 = vcmp.eq.f32.partialorder %v576_v25, 8.507059e+37 }
 0x2d8   :  { %v1306_v13 = vpop.eup %1305 }
 0x2d9   :  { %v586_v14 = vadd.f32 1.0, %v1306_v13 }
 0x2db   :  { %v1308_v15 = vpop.eup %1307  ;;  %1309 = vrcp.f32 %v586_v14  ;;  %v598_v50 = vand.u32 2147483648, %v586_v14  ;;  %vm592_vm13 = vweird.f32 %v586_v14  ;;  %v596_v34 = vand.u32 2147483647, %v586_v14 }
 0x2dc   :  { %v568_v16 = vmul.f32 %v1308_v15, %v566_v6  ;;  %vm573_vm8 = vweird.f32 %v1308_v15 }
 0x2dd   :  { %vm574_vm10 = vmor %vm572_vm9, %vm573_vm8  ;;  %v599_v54 = vor.u32 1.1754944e-38, %v598_v50  ;;  %vm597_vm15 = vcmp.eq.f32.partialorder %v596_v34, 8.507059e+37 }
 0x2de   :  { %v569_v17 = vsub.f32 1.0, %v568_v16 }
 0x2e0   :  { %v570_v24 = vmul.f32 %v1308_v15, %v569_v17 }
 0x2e1   :  { %v1310_v27 = vpop.eup %1309 }
 0x2e2   :  { %v588_v28 = vmul.f32 %v1310_v27, %v586_v14  ;;  %v571_v29 = vadd.f32 %v1308_v15, %v570_v24  ;;  %vm593_vm12 = vweird.f32 %v1310_v27 }
 0x2e3   :  { %vm594_vm14 = vmor %vm592_vm13, %vm593_vm12 }
 0x2e4   :  { %v589_v36 = vsub.f32 1.0, %v588_v28  ;;  %v575_v21 = vsel %vm574_vm10, %v1308_v15, %v571_v29  ;;  %v611_v15 = vld [vmem:[#allocation3 + $0x38] sm:$0xf] }
 0x2e5   :  { %v580_v40 = vsel %vm577_vm11, %v579_v33, %v575_v21  ;;  %v614_v23 = vunpack.c.l.bf16 %v611_v15 }
 0x2e6   :  { %v603_v43 = vmul.f32 %v602_v38, %v580_v40  ;;  %v590_v37 = vmul.f32 %v1310_v27, %v589_v36 }
 0x2e8   :  { %v604_v45 = vadd.f32 %v603_v43, %v521_v32  ;;  %v591_v46 = vadd.f32 %v1310_v27, %v590_v37 }
 0x2ea   :  { %1311 = vtanh.f32 %v604_v45  ;;  %v595_v51 = vsel %vm594_vm14, %v1310_v27, %v591_v46 }
 0x2eb   :  { %v600_v56 = vsel %vm597_vm15, %v599_v54, %v595_v51  ;;  %v703_v51 = vld [vmem:[#allocation3 + $0x3c] sm:$0xff] }
 0x2f0   :  { %v1312_v52 = vpop.eup %1311 }
 0x2f1   :  { %v606_v55 = vsub.f32 %v1706_v47, %v1312_v52 }
 0x2f3   :  { %v607_v59 = vmul.f32 %v606_v55, %v600_v56 }
 0x2f5   :  { %v1736_v60 = vadd.f32 %v1312_v52, %v607_v59  ;;  %v706_v52 = vunpack.c.h.bf16 %v703_v51 }
 0x2f7   :  { %v615_v61 = vpack.c.bf16 %v1736_v60, %v1736_v60 }
 0x2f9   :  { %624 = vmatmul.bf16.vlgmr.msrb.gmra.mxu0 %v615_v61  ;;  %637 = vmatmul.bf16.vlgmr.msrb.gmra.mxu1 %v615_v61 }
 0x2fa   :  { %650 = vmatmul.bf16.vlgmr.msrb.gmra.mxu2 %v615_v61  ;;  %828 = vmatpush.bf16.msrb.mxu0 %v1515_v18 }
 0x2fb   :  { %895 = vmatpush.bf16.msrb.mxu1 %v1504_v3  ;;  %908 = vmatpush.bf16.msrb.mxu2 %v1506_v7  ;;  %v610_v3 = vld [vmem:[#allocation3 + $0x30] sm:$0xff] }
 0x2fc   :  { %v612_v7 = vunpack.c.l.bf16 %v610_v3 }
 0x2fe   :  { %829 = vmatpush.bf16.msrb.mxu0 %v1525_v26 }
 0x2ff   :  { %896 = vmatpush.bf16.msrb.mxu1 %v1509_v10  ;;  %909 = vmatpush.bf16.msrb.mxu2 %v1513_v11  ;;  %v613_v10 = vunpack.c.h.bf16 %v610_v3 }
 0x302   :  { %830 = vmatpush.bf16.msrb.mxu0 %v1535_v35 }
 0x303   :  { %897 = vmatpush.bf16.msrb.mxu1 %v1518_v19  ;;  %910 = vmatpush.bf16.msrb.mxu2 %v1522_v22 }
 0x306   :  { %831 = vmatpush.bf16.msrb.mxu0 %v1545_v44 }
 0x307   :  { %898 = vmatpush.bf16.msrb.mxu1 %v1528_v30  ;;  %911 = vmatpush.bf16.msrb.mxu2 %v1532_v31 }
 0x30a   :  { %832 = vmatpush.bf16.msrb.mxu0 %v1555_v53 }
 0x30b   :  { %899 = vmatpush.bf16.msrb.mxu1 %v1538_v39  ;;  %912 = vmatpush.bf16.msrb.mxu2 %v1542_v42 }
 0x30e   :  { %833 = vmatpush.bf16.msrb.mxu0 %v1565_v62 }
 0x30f   :  { %900 = vmatpush.bf16.msrb.mxu1 %v1548_v48  ;;  %913 = vmatpush.bf16.msrb.mxu2 %v1552_v49 }
 0x312   :  { %834 = vmatpush.bf16.msrb.mxu0 %v1575_v5 }
 0x313   :  { %901 = vmatpush.bf16.msrb.mxu1 %v1558_v57  ;;  %914 = vmatpush.bf16.msrb.mxu2 %v1562_v58 }
 0x316   :  { %835 = vmatpush.bf16.msrb.mxu0 %v1581_v9 }
 0x317   :  { %902 = vmatpush.bf16.msrb.mxu1 %v1568_v2  ;;  %915 = vmatpush.bf16.msrb.mxu2 %v1572_v4 }
 0x376   :  { %v625_v11 = vpop.f32.mrf.mxu0  ;;  %v638_v19 = vpop.f32.mrf.mxu1 }
 0x377   :  { %v655_v22 = vadd.f32 %v625_v11, %v612_v7  ;;  %v675_v30 = vadd.f32 %v638_v19, %v613_v10 }
 0x379   :  { %v1190_v31 = vmul.f32 -1.442695, %v655_v22  ;;  %v1191_v39 = vmul.f32 -1.442695, %v675_v30 }
 0x37b   :  { %1313 = vpow2.f32 %v1190_v31 }
 0x37c   :  { %1315 = vpow2.f32 %v1191_v39 }
 0x37d   :  { %v651_v42 = vpop.f32.mrf.mxu2 }
 0x37e   :  { %v627_v48 = vpop.f32.mrf.mxu0  ;;  %v640_v49 = vpop.f32.mrf.mxu1  ;;  %v695_v25 = vadd.f32 %v1643_v41, %v651_v42  ;;  %v704_v42 = vld [vmem:[#allocation3 + $0x44] sm:$0xf] }
 0x381   :  { %v1314_v57 = vpop.eup %1313 }
 0x382   :  { %v1316_v58 = vpop.eup %1315  ;;  %v659_v47 = vadd.f32 1.0, %v1314_v57 }
 0x383   :  { %v679_v2 = vadd.f32 1.0, %v1316_v58 }
 0x384   :  { %1317 = vrcp.f32 %v659_v47  ;;  %v671_v12 = vand.u32 2147483648, %v659_v47  ;;  %v669_v14 = vand.u32 2147483647, %v659_v47  ;;  %vm665_vm1 = vweird.f32 %v659_v47 }
 0x385   :  { %1319 = vrcp.f32 %v679_v2  ;;  %v653_v4 = vpop.f32.mrf.mxu2  ;;  %v691_v36 = vand.u32 2147483648, %v679_v2  ;;  %vm685_vm5 = vweird.f32 %v679_v2  ;;  %v689_v21 = vand.u32 2147483647, %v679_v2 }
 0x386   :  { %v672_v20 = vor.u32 1.1754944e-38, %v671_v12  ;;  %vm670_vm3 = vcmp.eq.f32.partialorder %v669_v14, 8.507059e+37 }
 0x387   :  { %v692_v43 = vor.u32 1.1754944e-38, %v691_v36  ;;  %vm690_vm7 = vcmp.eq.f32.partialorder %v689_v21, 8.507059e+37 }
 0x38a   :  { %v1318_v63 = vpop.eup %1317 }
 0x38b   :  { %v1320_v0 = vpop.eup %1319  ;;  %v661_v1 = vmul.f32 %v1318_v63, %v659_v47  ;;  %vm666_vm0 = vweird.f32 %v1318_v63 }
 0x38c   :  { %v681_v8 = vmul.f32 %v1320_v0, %v679_v2  ;;  %vm667_vm2 = vmor %vm665_vm1, %vm666_vm0  ;;  %vm686_vm4 = vweird.f32 %v1320_v0  ;;  %v707_v2 = vunpack.c.l.bf16 %v704_v42 }
 0x38d   :  { %v662_v6 = vsub.f32 1.0, %v661_v1  ;;  %vm687_vm6 = vmor %vm685_vm5, %vm686_vm4 }
 0x38e   :  { %v682_v17 = vsub.f32 1.0, %v681_v8 }
 0x38f   :  { %v663_v13 = vmul.f32 %v1318_v63, %v662_v6 }
 0x390   :  { %v683_v29 = vmul.f32 %v1320_v0, %v682_v17 }
 0x391   :  { %v664_v16 = vadd.f32 %v1318_v63, %v663_v13 }
 0x392   :  { %v684_v33 = vadd.f32 %v1320_v0, %v683_v29 }
 0x393   :  { %v668_v24 = vsel %vm667_vm2, %v1318_v63, %v664_v16 }
 0x394   :  { %v673_v27 = vsel %vm670_vm3, %v672_v20, %v668_v24  ;;  %v688_v38 = vsel %vm687_vm6, %v1320_v0, %v684_v33 }
 0x395   :  { %v696_v28 = vmul.f32 %v695_v25, %v673_v27  ;;  %v693_v45 = vsel %vm690_vm7, %v692_v43, %v688_v38  ;;  %v796_v25 = vld [vmem:[#allocation3 + $0x48] sm:$0xff] }
 0x396   :  { %v799_v29 = vunpack.c.h.bf16 %v796_v25 }
 0x397   :  { %v697_v32 = vadd.f32 %v696_v28, %v614_v23  ;;  %v798_v28 = vunpack.c.l.bf16 %v796_v25 }
 0x399   :  { %1321 = vtanh.f32 %v697_v32 }
 0x39f   :  { %v1322_v40 = vpop.eup %1321 }
 0x3a0   :  { %v699_v37 = vsub.f32 %v1736_v60, %v1322_v40 }
 0x3a2   :  { %v700_v46 = vmul.f32 %v699_v37, %v693_v45 }
 0x3a4   :  { %v1766_v50 = vadd.f32 %v1322_v40, %v700_v46 }
 0x3a6   :  { %v708_v34 = vpack.c.bf16 %v1766_v50, %v1766_v50 }
 0x3a8   :  { %717 = vmatmul.bf16.vlgmr.msrb.gmra.mxu3 %v708_v34  ;;  %730 = vmatmul.bf16.vlgmr.msra.gmra.mxu0 %v708_v34 }
 0x3a9   :  { %743 = vmatmul.bf16.vlgmr.msra.gmra.mxu1 %v708_v34  ;;  %921 = vmatpush.bf16.msrb.mxu3 %v1515_v18  ;;  %v705_v18 = vunpack.c.l.bf16 %v703_v51 }
 0x3ad   :  { %922 = vmatpush.bf16.msrb.mxu3 %v1525_v26 }
 0x3b1   :  { %923 = vmatpush.bf16.msrb.mxu3 %v1535_v35 }
 0x3b5   :  { %924 = vmatpush.bf16.msrb.mxu3 %v1545_v44 }
 0x3b9   :  { %925 = vmatpush.bf16.msrb.mxu3 %v1555_v53 }
 0x3bd   :  { %926 = vmatpush.bf16.msrb.mxu3 %v1565_v62 }
 0x3c1   :  { %927 = vmatpush.bf16.msrb.mxu3 %v1575_v5 }
 0x3c5   :  { %928 = vmatpush.bf16.msrb.mxu3 %v1581_v9 }
 0x425   :  { %v731_v54 = vpop.f32.mrf.mxu0 }
 0x426   :  { %v768_v55 = vadd.f32 %v731_v54, %v706_v52  ;;  %v744_v56 = vpop.f32.mrf.mxu1 }
 0x427   :  { %v788_v58 = vadd.f32 %v1643_v41, %v744_v56 }
 0x428   :  { %v1193_v59 = vmul.f32 -1.442695, %v768_v55 }
 0x42a   :  { %1323 = vpow2.f32 %v1193_v59 }
 0x42b   :  { %v718_v26 = vpop.f32.mrf.mxu3 }
 0x42c   :  { %v748_v60 = vadd.f32 %v718_v26, %v705_v18 }
 0x42d   :  { %v733_v35 = vpop.f32.mrf.mxu0 }
 0x42e   :  { %v1192_v44 = vmul.f32 -1.442695, %v748_v60  ;;  %v746_v61 = vpop.f32.mrf.mxu1  ;;  %v797_v35 = vld [vmem:[#allocation3 + $0x50] sm:$0xf] }
 0x430   :  { %1325 = vpow2.f32 %v1192_v44  ;;  %v1324_v53 = vpop.eup %1323 }
 0x431   :  { %v772_v5 = vadd.f32 1.0, %v1324_v53 }
 0x433   :  { %v720_v62 = vpop.f32.mrf.mxu3  ;;  %v784_v8 = vand.u32 2147483648, %v772_v5  ;;  %vm778_vm13 = vweird.f32 %v772_v5  ;;  %v782_v12 = vand.u32 2147483647, %v772_v5 }
 0x435   :  { %v785_v15 = vor.u32 1.1754944e-38, %v784_v8  ;;  %vm783_vm15 = vcmp.eq.f32.partialorder %v782_v12, 8.507059e+37  ;;  %v1257_v12 = vld [vmem:[#allocation8 + $0x18] sm:$0xff] }
 0x436   :  { %v1326_v3 = vpop.eup %1325 }
 0x437   :  { %v752_v7 = vadd.f32 1.0, %v1326_v3 }
 0x439   :  { %1327 = vrcp.f32 %v752_v7  ;;  %v764_v30 = vand.u32 2147483648, %v752_v7  ;;  %v762_v39 = vand.u32 2147483647, %v752_v7  ;;  %vm758_vm9 = vweird.f32 %v752_v7 }
 0x43a   :  { %1329 = vrcp.f32 %v772_v5 }
 0x43b   :  { %v765_v57 = vor.u32 1.1754944e-38, %v764_v30  ;;  %vm763_vm11 = vcmp.eq.f32.partialorder %v762_v39, 8.507059e+37 }
 0x43f   :  { %v1328_v9 = vpop.eup %1327 }
 0x440   :  { %v1330_v10 = vpop.eup %1329  ;;  %v754_v11 = vmul.f32 %v1328_v9, %v752_v7  ;;  %vm759_vm8 = vweird.f32 %v1328_v9 }
 0x441   :  { %v774_v22 = vmul.f32 %v1330_v10, %v772_v5  ;;  %vm760_vm10 = vmor %vm758_vm9, %vm759_vm8  ;;  %vm779_vm12 = vweird.f32 %v1330_v10  ;;  %v800_v5 = vunpack.c.l.bf16 %v797_v35 }
 0x442   :  { %v755_v19 = vsub.f32 1.0, %v754_v11  ;;  %vm780_vm14 = vmor %vm778_vm13, %vm779_vm12 }
 0x443   :  { %v775_v49 = vsub.f32 1.0, %v774_v22 }
 0x444   :  { %v756_v31 = vmul.f32 %v1328_v9, %v755_v19 }
 0x445   :  { %v776_v0 = vmul.f32 %v1330_v10, %v775_v49 }
 0x446   :  { %v757_v48 = vadd.f32 %v1328_v9, %v756_v31 }
 0x447   :  { %v777_v6 = vadd.f32 %v1330_v10, %v776_v0 }
 0x448   :  { %v761_v47 = vsel %vm760_vm10, %v1328_v9, %v757_v48 }
 0x449   :  { %v766_v4 = vsel %vm763_vm11, %v765_v57, %v761_v47  ;;  %v781_v13 = vsel %vm780_vm14, %v1330_v10, %v777_v6  ;;  %v1261_v47 = vld [vmem:[#allocation8 + $0x38] sm:$0xff] }
 0x44a   :  { %v789_v63 = vmul.f32 %v788_v58, %v766_v4  ;;  %v786_v17 = vsel %vm783_vm15, %v785_v15, %v781_v13  ;;  %1054 = vmatpush.bf16.msra.mxu0 %v1261_v47  ;;  %v889_v4 = vld [vmem:[#allocation3 + $0x54] sm:$0xff] }
 0x44b   :  { %v891_v0 = vunpack.c.l.bf16 %v889_v4  ;;  %v1256_v15 = vld [vmem:[#allocation8 + $0x10] sm:$0xff] }
 0x44c   :  { %v790_v1 = vadd.f32 %v789_v63, %v707_v2  ;;  %v1260_v2 = vld [vmem:[#allocation8 + $0x30] sm:$0xff]  ;;  %v1259_v63 = vld [vmem:[#allocation8 + $0x28] sm:$0xff] }
 0x44e   :  { %1331 = vtanh.f32 %v790_v1  ;;  %1055 = vmatpush.bf16.msra.mxu0 %v1260_v2  ;;  %v1258_v1 = vld [vmem:[#allocation8 + $0x20] sm:$0xff] }
 0x452   :  { %1056 = vmatpush.bf16.msra.mxu0 %v1259_v63 }
 0x454   :  { %v1332_v14 = vpop.eup %1331 }
 0x455   :  { %v792_v16 = vsub.f32 %v1766_v50, %v1332_v14 }
 0x456   :  { %1057 = vmatpush.bf16.msra.mxu0 %v1258_v1 }
 0x457   :  { %v793_v20 = vmul.f32 %v792_v16, %v786_v17 }
 0x459   :  { %v1780_v23 = vadd.f32 %v1332_v14, %v793_v20  ;;  %v892_v14 = vunpack.c.h.bf16 %v889_v4 }
 0x45a   :  { %1058 = vmatpush.bf16.msra.mxu0 %v1257_v12 }
 0x45b   :  { %v801_v24 = vpack.c.bf16 %v1780_v23, %v1780_v23 }
 0x45d   :  { %810 = vmatmul.bf16.vlgmr.msra.gmra.mxu2 %v801_v24  ;;  %823 = vmatmul.bf16.vlgmr.msra.gmra.mxu3 %v801_v24 }
 0x45e   :  { %836 = vmatmul.bf16.vlgmr.msrb.gmra.mxu0 %v801_v24  ;;  %v1255_v24 = vld [vmem:[#allocation8 + $0x8] sm:$0xff] }
 0x45f   :  { %1059 = vmatpush.bf16.msra.mxu0 %v1256_v15 }
 0x463   :  { %1060 = vmatpush.bf16.msra.mxu0 %v1255_v24 }
 0x4db   :  { %v837_v27 = vpop.f32.mrf.mxu0 }
 0x4dc   :  { %v881_v62 = vadd.f32 %v1643_v41, %v837_v27 }
 0x4e0   :  { %v811_v32 = vpop.f32.mrf.mxu2  ;;  %v824_v33 = vpop.f32.mrf.mxu3 }
 0x4e1   :  { %v841_v36 = vadd.f32 %v811_v32, %v798_v28  ;;  %v861_v21 = vadd.f32 %v824_v33, %v799_v29  ;;  %v1254_v29 = vld [vmem:[#allocation8] sm:$0xff] }
 0x4e2   :  { %1061 = vmatpush.bf16.msra.mxu0 %v1254_v29 }
 0x4e3   :  { %v1194_v38 = vmul.f32 -1.442695, %v841_v36  ;;  %v1195_v40 = vmul.f32 -1.442695, %v861_v21  ;;  %v839_v43 = vpop.f32.mrf.mxu0 }
 0x4e5   :  { %1333 = vpow2.f32 %v1194_v38 }
 0x4e6   :  { %1335 = vpow2.f32 %v1195_v40 }
 0x4e8   :  { %v813_v37 = vpop.f32.mrf.mxu2  ;;  %v826_v45 = vpop.f32.mrf.mxu3 }
 0x4e9   :  { %v890_v45 = vld [vmem:[#allocation3 + $0x5c] sm:$0xf] }
 0x4eb   :  { %v1334_v46 = vpop.eup %1333 }
 0x4ec   :  { %v1336_v50 = vpop.eup %1335  ;;  %v845_v34 = vadd.f32 1.0, %v1334_v46 }
 0x4ed   :  { %v865_v51 = vadd.f32 1.0, %v1336_v50 }
 0x4ee   :  { %1337 = vrcp.f32 %v845_v34  ;;  %v857_v18 = vand.u32 2147483648, %v845_v34  ;;  %v855_v60 = vand.u32 2147483647, %v845_v34  ;;  %vm851_vm1 = vweird.f32 %v845_v34 }
 0x4ef   :  { %1339 = vrcp.f32 %v865_v51  ;;  %v877_v22 = vand.u32 2147483648, %v865_v51  ;;  %vm871_vm5 = vweird.f32 %v865_v51  ;;  %v875_v30 = vand.u32 2147483647, %v865_v51 }
 0x4f0   :  { %v858_v61 = vor.u32 1.1754944e-38, %v857_v18  ;;  %vm856_vm3 = vcmp.eq.f32.partialorder %v855_v60, 8.507059e+37 }
 0x4f1   :  { %v878_v42 = vor.u32 1.1754944e-38, %v877_v22  ;;  %vm876_vm7 = vcmp.eq.f32.partialorder %v875_v30, 8.507059e+37 }
 0x4f4   :  { %v1338_v52 = vpop.eup %1337 }
 0x4f5   :  { %v1340_v54 = vpop.eup %1339  ;;  %v847_v55 = vmul.f32 %v1338_v52, %v845_v34  ;;  %vm852_vm0 = vweird.f32 %v1338_v52 }
 0x4f6   :  { %v867_v59 = vmul.f32 %v1340_v54, %v865_v51  ;;  %vm853_vm2 = vmor %vm851_vm1, %vm852_vm0  ;;  %vm872_vm4 = vweird.f32 %v1340_v54 }
 0x4f7   :  { %v848_v56 = vsub.f32 1.0, %v847_v55  ;;  %vm873_vm6 = vmor %vm871_vm5, %vm872_vm4 }
 0x4f8   :  { %v868_v53 = vsub.f32 1.0, %v867_v59  ;;  %v1353_v59 = vld [vmem:[%s1802_s2] ss:$0 sm:$0xff] }
 0x4f9   :  { %v849_v26 = vmul.f32 %v1338_v52, %v848_v56 }
 0x4fa   :  { %v869_v10 = vmul.f32 %v1340_v54, %v868_v53 }
 0x4fb   :  { %v850_v44 = vadd.f32 %v1338_v52, %v849_v26 }
 0x4fc   :  { %v870_v19 = vadd.f32 %v1340_v54, %v869_v10 }
 0x4fd   :  { %v854_v3 = vsel %vm853_vm2, %v1338_v52, %v850_v44 }
 0x4fe   :  { %v859_v7 = vsel %vm856_vm3, %v858_v61, %v854_v3  ;;  %v874_v31 = vsel %vm873_vm6, %v1340_v54, %v870_v19  ;;  %v893_v54 = vunpack.c.l.bf16 %v890_v45 }
 0x4ff   :  { %v882_v9 = vmul.f32 %v881_v62, %v859_v7  ;;  %v879_v48 = vsel %vm876_vm7, %v878_v42, %v874_v31  ;;  %v1272_v31 = vld [vmem:[%s1804_s4] ss:$0 sm:$0xff] }
 0x501   :  { %v883_v11 = vadd.f32 %v882_v9, %v800_v5 }
 0x503   :  { %1341 = vtanh.f32 %v883_v11 }
 0x509   :  { %v1342_v39 = vpop.eup %1341 }
 0x50a   :  { %v885_v41 = vsub.f32 %v1780_v23, %v1342_v39 }
 0x50c   :  { %v886_v49 = vmul.f32 %v885_v41, %v879_v48 }
 0x50e   :  { %v1786_v57 = vadd.f32 %v1342_v39, %v886_v49 }
 0x510   :  { %v894_v58 = vpack.c.bf16 %v1786_v57, %v1786_v57 }
 0x512   :  { %903 = vmatmul.bf16.vlgmr.msrb.gmra.mxu1 %v894_v58  ;;  %916 = vmatmul.bf16.vlgmr.msrb.gmra.mxu2 %v894_v58 }
 0x513   :  { %929 = vmatmul.bf16.vlgmr.msrb.gmra.mxu3 %v894_v58 }
 0x58f   :  { %v904_v6 = vpop.f32.mrf.mxu1 }
 0x590   :  { %v934_v8 = vadd.f32 %v904_v6, %v891_v0 }
 0x592   :  { %v1196_v13 = vmul.f32 -1.442695, %v934_v8 }
 0x594   :  { %1343 = vpow2.f32 %v1196_v13 }
 0x595   :  { %v917_v16 = vpop.f32.mrf.mxu2 }
 0x596   :  { %v954_v17 = vadd.f32 %v917_v16, %v892_v14  ;;  %v930_v20 = vpop.f32.mrf.mxu3 }
 0x597   :  { %v906_v23 = vpop.f32.mrf.mxu1  ;;  %v974_v26 = vadd.f32 %v1353_v59, %v930_v20 }
 0x598   :  { %v1197_v25 = vmul.f32 -1.442695, %v954_v17 }
 0x59a   :  { %v1344_v27 = vpop.eup %1343  ;;  %1345 = vpow2.f32 %v1197_v25 }
 0x59b   :  { %v938_v28 = vadd.f32 1.0, %v1344_v27 }
 0x59d   :  { %1347 = vrcp.f32 %v938_v28  ;;  %v919_v32 = vpop.f32.mrf.mxu2  ;;  %v950_v37 = vand.u32 2147483648, %v938_v28  ;;  %v948_v50 = vand.u32 2147483647, %v938_v28  ;;  %vm944_vm9 = vweird.f32 %v938_v28 }
 0x59e   :  { %v932_v33 = vpop.f32.mrf.mxu3 }
 0x59f   :  { %v951_v55 = vor.u32 1.1754944e-38, %v950_v37  ;;  %vm949_vm11 = vcmp.eq.f32.partialorder %v948_v50, 8.507059e+37 }
 0x5a0   :  { %v1346_v36 = vpop.eup %1345 }
 0x5a1   :  { %v958_v21 = vadd.f32 1.0, %v1346_v36 }
 0x5a3   :  { %v1348_v38 = vpop.eup %1347  ;;  %1349 = vrcp.f32 %v958_v21  ;;  %v970_v62 = vand.u32 2147483648, %v958_v21  ;;  %vm964_vm13 = vweird.f32 %v958_v21  ;;  %v968_v3 = vand.u32 2147483647, %v958_v21 }
 0x5a4   :  { %v940_v40 = vmul.f32 %v1348_v38, %v938_v28  ;;  %vm945_vm8 = vweird.f32 %v1348_v38 }
 0x5a5   :  { %vm946_vm10 = vmor %vm944_vm9, %vm945_vm8  ;;  %v971_v9 = vor.u32 1.1754944e-38, %v970_v62  ;;  %vm969_vm15 = vcmp.eq.f32.partialorder %v968_v3, 8.507059e+37 }
 0x5a6   :  { %v941_v43 = vsub.f32 1.0, %v940_v40 }
 0x5a8   :  { %v942_v46 = vmul.f32 %v1348_v38, %v941_v43 }
 0x5a9   :  { %v1350_v34 = vpop.eup %1349 }
 0x5aa   :  { %v960_v51 = vmul.f32 %v1350_v34, %v958_v21  ;;  %v943_v52 = vadd.f32 %v1348_v38, %v942_v46  ;;  %vm965_vm12 = vweird.f32 %v1350_v34 }
 0x5ab   :  { %vm966_vm14 = vmor %vm964_vm13, %vm965_vm12 }
 0x5ac   :  { %v961_v56 = vsub.f32 1.0, %v960_v51  ;;  %v947_v18 = vsel %vm946_vm10, %v1348_v38, %v943_v52 }
 0x5ad   :  { %v952_v60 = vsel %vm949_vm11, %v951_v55, %v947_v18 }
 0x5ae   :  { %v975_v35 = vmul.f32 %v974_v26, %v952_v60  ;;  %v962_v44 = vmul.f32 %v1350_v34, %v961_v56 }
 0x5b0   :  { %v976_v61 = vadd.f32 %v975_v35, %v893_v54  ;;  %v963_v53 = vadd.f32 %v1350_v34, %v962_v44 }
 0x5b2   :  { %1351 = vtanh.f32 %v976_v61  ;;  %v967_v5 = vsel %vm966_vm14, %v1350_v34, %v963_v53 }
 0x5b3   :  { %v972_v11 = vsel %vm969_vm15, %v971_v9, %v967_v5 }
 0x5b8   :  { %v1352_v7 = vpop.eup %1351 }
 0x5b9   :  { %v978_v10 = vsub.f32 %v1786_v57, %v1352_v7 }
 0x5bb   :  { %v979_v19 = vmul.f32 %v978_v10, %v972_v11 }
 0x5bd   :  { %v980_v22 = vadd.f32 %v1352_v7, %v979_v19 }
 0x5bf   :  { %v985_v30 = vpack.c.bf16 %v980_v22, %v980_v22 }
 0x5c1   :  { %1062 = vmatmul.bf16.vlgmr.msra.gmra.mxu0 %v985_v30 }
 0x63e   :  { %v1063_v39 = vpop.f32.mrf.mxu0 }
 0x63f   :  { %v1064_v42 = vadd.f32 %v1272_v31, %v1063_v39 }
 0x641   :  { %1067 = vst [vmem:[#allocation9] sm:$0xff] %v1064_v42 }
 0x642   :  { %1078 = dma.vmem_to_hbm [thread:$0]  %s1074_s15, 128, %s1076_s18, [#allocation5]  }
 0x646   :  { %v1065_v41 = vpop.f32.mrf.mxu0 }
 0x647   :  { %1454 = dma.done.wait [#allocation5], 128  }
 0x648   :  { %1455 = vsyncadd [#allocation5], 4294967168 }
 0x649   :  { %1083 = vsyncpa [#allocation4], 1 }
 0x64a   :  { %1084 = vsyncpa [#allocation7], 1 }
 0x64b   :  { %1085 = vsyncpa [#allocation5], 1 }

</bundles_post_ra>
